<compile_context>
chip_gen: v5e
topology: v5e:2x2
jax: 0.10.0
libtpu: 0.0.40
codegen_flags: <defaults>
</compile_context>

<pallas_src>
import jax
import jax.numpy as jnp
from jax.experimental import pallas as pl
from jax.experimental.pallas import tpu as pltpu

BERT_DIM = 768
NUM_CHUNKS = 7
ATTEN_IN = 64
ATTEN_UNIT = 64
NUM_HEADS = 5
FEAT = NUM_CHUNKS * BERT_DIM          # 5376
OUT_DIM = NUM_HEADS * ATTEN_IN        # 320
A_DIM = NUM_CHUNKS * NUM_HEADS        # 35
SLAB_DIM = 384                        # 320 (out) + 35 (A, chunk-major) + 29 (pad) = 3*128

_W_BYTES = (BERT_DIM * ATTEN_IN * 2 + ATTEN_IN * 4
            + ATTEN_IN * ATTEN_UNIT * 4 + ATTEN_UNIT * NUM_HEADS * 4)
_HEADROOM = 6 << 20                   # intermediates / spill slack inside the body


def _round_up(n, m):
    return ((n + m - 1) // m) * m


def _vmem_budget_bytes():
    """Generation-aware scoped-VMEM budget: ~40 MiB on 64 MiB chips (v7x), ~96 MiB on 128 MiB."""
    try:
        cap = int(pltpu.get_tpu_info().vmem_capacity_bytes)
    except Exception:
        cap = 64 << 20                # conservative fallback
    return (40 << 20) if cap <= (64 << 20) else (96 << 20)


def _double_buffered_bytes(bt, x_itemsize):
    return 2 * bt * FEAT * x_itemsize + 2 * bt * SLAB_DIM * 4 + 2 * _W_BYTES


def _pick_batch_tile(B, b_tile, budget, x_itemsize):
    # >= 2 grid steps whenever B allows it, so the 'parallel' axis shards across v7x cores.
    bt = min(b_tile, max(8, _round_up(-(-B // 2), 8)))
    bt = _round_up(bt, 8)
    while bt > 8 and _double_buffered_bytes(bt, x_itemsize) + _HEADROOM > budget:
        bt = max(8, _round_up(bt // 2, 8))
    return bt


def time_async_kernel(x_ref, wb_ref, bb_ref, w1_ref, w2_ref, slab_ref):
    # x_ref : (bt, 5376) f32 (or bf16) -- one batch tile, 7 chunks concatenated on lanes
    # wb_ref: (768, 64) bf16, bb_ref: (1, 64) f32
    # w1_ref: (64, 64) f32,  w2_ref: (64, 5) f32
    # slab_ref: (bt, 384) f32 -- [0:320]=pooled out, [320:355]=chunk-major A, [355:384]=pad
    bt = x_ref.shape[0]
    wb = wb_ref[...]
    bb = jnp.broadcast_to(bb_ref[...], (bt, ATTEN_IN))   # hoisted: broadcast once, not 7x
    w1 = w1_ref[...]
    w2 = w2_ref[...]

    h_list = []       # 7 x (bt, 64) f32
    score_list = []   # 7 x (bt, 5)  f32
    for s in range(NUM_CHUNKS):
        # Static 128-aligned lane slice; bf16 cast on the VPU (hidden under the x DMA).
        xs = x_ref[:, s * BERT_DIM:(s + 1) * BERT_DIM].astype(jnp.bfloat16)
        h = jnp.dot(xs, wb, preferred_element_type=jnp.float32) + bb
        h = jnp.maximum(h, 0.0)                                    # relu -> (bt, 64) f32
        a = jnp.tanh(jnp.dot(h, w1, preferred_element_type=jnp.float32))
        sc = jnp.dot(a, w2, preferred_element_type=jnp.float32)   # (bt, 5)
        h_list.append(h)
        score_list.append(sc)

    # Softmax over the 7 chunks (sequence axis), elementwise across the per-chunk scores.
    m = score_list[0]
    for s in range(1, NUM_CHUNKS):
        m = jnp.maximum(m, score_list[s])
    e_list = [jnp.exp(sc - m) for sc in score_list]
    denom = e_list[0]
    for s in range(1, NUM_CHUNKS):
        denom = denom + e_list[s]
    inv = pl.reciprocal(denom, approx=False)                       # exact: tighter parity, EUP has slack
    soft_list = [e * inv for e in e_list]                          # 7 x (bt, 5)

    # out[b, h*64:(h+1)*64] = sum_s soft_s[b, h] * H_s[b, :]  -- pure VPU work, no tiny MXU bmm.
    head_outs = []
    for hd in range(NUM_HEADS):
        acc = soft_list[0][:, hd:hd + 1] * h_list[0]
        for s in range(1, NUM_CHUNKS):
            acc = acc + soft_list[s][:, hd:hd + 1] * h_list[s]
        head_outs.append(acc)                                      # (bt, 64)

    # dropout(p=0.5) is identity at inference time (eval mode).
    # Single lane-dense (bt, 384) store: pooled output + chunk-major A + zero pad.
    pad = jnp.zeros((bt, SLAB_DIM - OUT_DIM - A_DIM), jnp.float32)
    slab_ref[...] = jnp.concatenate(head_outs + soft_list + [pad], axis=1)


def time_async(x, wb, bb, w1, w2, *, b_tile=1024):
    """x: (B, 7*768) f32 (or bf16) -> (out (B, 320) f32, A (B, 5, 7) f32)."""
    B = x.shape[0]
    assert x.shape[1] == FEAT

    x_itemsize = jnp.dtype(x.dtype).itemsize
    wb_bf = wb.astype(jnp.bfloat16)          # tiny one-time cast (768x64)

    budget = _vmem_budget_bytes()
    bt = _pick_batch_tile(B, b_tile, budget, x_itemsize)
    grid = (pl.cdiv(B, bt),)                 # partial last block: no padded copy of x

    flops = int(2 * B * NUM_CHUNKS * BERT_DIM * ATTEN_IN
                + 2 * B * NUM_CHUNKS * ATTEN_IN * ATTEN_UNIT
                + 2 * B * NUM_CHUNKS * ATTEN_UNIT * NUM_HEADS
                + 2 * B * NUM_CHUNKS * NUM_HEADS * ATTEN_IN)
    transcendentals = int(B * NUM_CHUNKS * ATTEN_UNIT + B * NUM_CHUNKS * NUM_HEADS + B * NUM_HEADS)
    bytes_accessed = int(B * FEAT * x_itemsize + B * SLAB_DIM * 4 + _W_BYTES)

    slab = pl.pallas_call(
        time_async_kernel,
        out_shape=jax.ShapeDtypeStruct((B, SLAB_DIM), jnp.float32),
        grid=grid,
        in_specs=[
            pl.BlockSpec((bt, FEAT), lambda i: (i, 0)),
            pl.BlockSpec((BERT_DIM, ATTEN_IN), lambda i: (0, 0)),
            pl.BlockSpec((1, ATTEN_IN), lambda i: (0, 0)),
            pl.BlockSpec((ATTEN_IN, ATTEN_UNIT), lambda i: (0, 0)),
            pl.BlockSpec((ATTEN_UNIT, NUM_HEADS), lambda i: (0, 0)),
        ],
        out_specs=pl.BlockSpec((bt, SLAB_DIM), lambda i: (i, 0)),
        compiler_params=pltpu.CompilerParams(
            dimension_semantics=("parallel",),
            vmem_limit_bytes=int(budget),
        ),
        cost_estimate=pl.CostEstimate(
            flops=flops, transcendentals=transcendentals, bytes_accessed=bytes_accessed),
    )(x, wb_bf, bb, w1, w2)

    out = slab[:, :OUT_DIM]
    A = jnp.transpose(
        slab[:, OUT_DIM:OUT_DIM + A_DIM].reshape(B, NUM_CHUNKS, NUM_HEADS), (0, 2, 1))  # (B, 5, 7)
    return out, A


def time_async_ref(x, wb, bb, w1, w2):
    """Pure-JAX f32 reference matching the PyTorch forward."""
    B = x.shape[0]
    xs = x.reshape(B, NUM_CHUNKS, BERT_DIM)
    h = jnp.maximum(jnp.einsum("bsd,df->bsf", xs, wb) + bb.reshape(1, 1, -1), 0.0)
    sc = jnp.tanh(h @ w1) @ w2                       # (B, 7, 5)
    soft = jax.nn.softmax(sc, axis=1)                # softmax over the sequence axis
    A = jnp.transpose(soft, (0, 2, 1))               # (B, 5, 7)
    out = jnp.einsum("bhs,bsf->bhf", A, h).reshape(B, -1)
    return out, A


def init_params(key):
    """Deterministic synthetic parameters matching the PyTorch module shapes."""
    k1, k2, k3, k4 = jax.random.split(key, 4)
    bound = 1.0 / (BERT_DIM ** 0.5)
    # nn.Linear(768, 64): weight stored here as (in, out), plus bias
    wb = jax.random.uniform(k1, (BERT_DIM, ATTEN_IN), jnp.float32, -bound, bound)
    bb = jax.random.uniform(k2, (1, ATTEN_IN), jnp.float32, -bound, bound)
    # SelfAttentiveLayer.init_weights: uniform(-0.1, 0.1), no bias
    w1 = jax.random.uniform(k3, (ATTEN_IN, ATTEN_UNIT), jnp.float32, -0.1, 0.1)
    w2 = jax.random.uniform(k4, (ATTEN_UNIT, NUM_HEADS), jnp.float32, -0.1, 0.1)
    return wb, bb, w1, w2


def _check(B, key):
    kp, kx = jax.random.split(key)
    wb, bb, w1, w2 = init_params(kp)
    x = jax.random.normal(kx, (B, NUM_CHUNKS * BERT_DIM), dtype=jnp.float32)

    out, A = jax.jit(time_async)(x, wb, bb, w1, w2)
    jax.block_until_ready((out, A))

    assert out.shape == (B, OUT_DIM)
    assert A.shape == (B, NUM_HEADS, NUM_CHUNKS)

    # Loose tolerance: the 768->64 GEMM runs with bf16 operands (f32 accumulation on MXU).
    out_ref, A_ref = time_async_ref(x, wb, bb, w1, w2)
    assert float(jnp.max(jnp.abs(out - out_ref))) < 0.05
    assert float(jnp.max(jnp.abs(A - A_ref))) < 0.05
    assert float(jnp.max(jnp.abs(jnp.sum(A, axis=-1) - 1.0))) < 1e-3  # exact-reciprocal softmax


if __name__ == "__main__":
    key = jax.random.PRNGKey(0)
    k1, k2 = jax.random.split(key)
    _check(B=2, key=k1)    # single (partial) block
    _check(B=10, key=k2)   # multi-step grid with a partial last block (no x pad path)
    print("KERNEL_OK")
</pallas_src>

<mosaic_0001>
module attributes {stable_mosaic.version = 11 : i64} {
  func.func @time_async_kernel(%arg0: i32, %arg1: memref<8x5376xf32, #tpu.memory_space<vmem>>, %arg2: memref<768x64xbf16, #tpu.memory_space<vmem>>, %arg3: memref<1x64xf32, #tpu.memory_space<vmem>>, %arg4: memref<64x64xf32, #tpu.memory_space<vmem>>, %arg5: memref<64x5xf32, #tpu.memory_space<vmem>>, %arg6: memref<8x384xf32, #tpu.memory_space<vmem>>) attributes {dimension_semantics = [#tpu.dimension_semantics<parallel>], iteration_bounds = array<i64: 1>, scalar_prefetch = 0 : i64, scratch_operands = 0 : i64, tpu.core_type = #tpu.core_type<tc>, window_params = [{transform_indices = @transform_0, window_bounds = array<i64: 8, 5376>}, {pipeline_mode = #tpu.pipeline_mode<synchronous>, transform_indices = @transform_1, window_bounds = array<i64: 768, 64>}, {pipeline_mode = #tpu.pipeline_mode<synchronous>, transform_indices = @transform_2, window_bounds = array<i64: 1, 64>}, {pipeline_mode = #tpu.pipeline_mode<synchronous>, transform_indices = @transform_3, window_bounds = array<i64: 64, 64>}, {pipeline_mode = #tpu.pipeline_mode<synchronous>, transform_indices = @transform_4, window_bounds = array<i64: 64, 5>}, {transform_indices = @transform_5, window_bounds = array<i64: 8, 384>}]} {
    %c0 = arith.constant 0 : index
    %c0_0 = arith.constant 0 : index
    %0 = vector.load %arg2[%c0, %c0_0] : memref<768x64xbf16, #tpu.memory_space<vmem>>, vector<768x64xbf16>
    %c0_1 = arith.constant 0 : index
    %c0_2 = arith.constant 0 : index
    %1 = vector.load %arg3[%c0_1, %c0_2] : memref<1x64xf32, #tpu.memory_space<vmem>>, vector<1x64xf32>
    %2 = vector.shape_cast %1 : vector<1x64xf32> to vector<1x64xf32>
    %3 = vector.broadcast %2 : vector<1x64xf32> to vector<8x64xf32>
    %c0_3 = arith.constant 0 : index
    %c0_4 = arith.constant 0 : index
    %4 = vector.load %arg4[%c0_3, %c0_4] : memref<64x64xf32, #tpu.memory_space<vmem>>, vector<64x64xf32>
    %c0_5 = arith.constant 0 : index
    %c0_6 = arith.constant 0 : index
    %5 = vector.load %arg5[%c0_5, %c0_6] : memref<64x5xf32, #tpu.memory_space<vmem>>, vector<64x5xf32>
    %c0_7 = arith.constant 0 : index
    %c0_8 = arith.constant 0 : index
    %6 = vector.load %arg1[%c0_7, %c0_8] : memref<8x5376xf32, #tpu.memory_space<vmem>>, vector<8x768xf32>
    %7 = arith.truncf %6 : vector<8x768xf32> to vector<8x768xbf16>
    %cst = arith.constant dense<0.000000e+00> : vector<8x64xf32>
    %8 = tpu.matmul %7, %0, %cst {dimension_numbers = #tpu.dot_dimension_numbers<[1], [0], [0], [1], [0, 0, 1, 1], [], []>} : vector<8x768xbf16>, vector<768x64xbf16>, vector<8x64xf32> -> vector<8x64xf32>
    %9 = arith.addf %8, %3 : vector<8x64xf32>
    %cst_9 = arith.constant 0.000000e+00 : f32
    %10 = vector.broadcast %cst_9 : f32 to vector<8x64xf32>
    %11 = arith.maximumf %9, %10 : vector<8x64xf32>
    %cst_10 = arith.constant dense<0.000000e+00> : vector<8x64xf32>
    %12 = tpu.matmul %11, %4, %cst_10 {dimension_numbers = #tpu.dot_dimension_numbers<[1], [0], [0], [1], [0, 0, 1, 1], [], []>} : vector<8x64xf32>, vector<64x64xf32>, vector<8x64xf32> -> vector<8x64xf32>
    %13 = math.tanh %12 : vector<8x64xf32>
    %cst_11 = arith.constant dense<0.000000e+00> : vector<8x5xf32>
    %14 = tpu.matmul %13, %5, %cst_11 {dimension_numbers = #tpu.dot_dimension_numbers<[1], [0], [0], [1], [0, 0, 1, 1], [], []>} : vector<8x64xf32>, vector<64x5xf32>, vector<8x5xf32> -> vector<8x5xf32>
    %c0_12 = arith.constant 0 : index
    %c768 = arith.constant 768 : index
    %15 = vector.load %arg1[%c0_12, %c768] : memref<8x5376xf32, #tpu.memory_space<vmem>>, vector<8x768xf32>
    %16 = arith.truncf %15 : vector<8x768xf32> to vector<8x768xbf16>
    %cst_13 = arith.constant dense<0.000000e+00> : vector<8x64xf32>
    %17 = tpu.matmul %16, %0, %cst_13 {dimension_numbers = #tpu.dot_dimension_numbers<[1], [0], [0], [1], [0, 0, 1, 1], [], []>} : vector<8x768xbf16>, vector<768x64xbf16>, vector<8x64xf32> -> vector<8x64xf32>
    %18 = arith.addf %17, %3 : vector<8x64xf32>
    %cst_14 = arith.constant 0.000000e+00 : f32
    %19 = vector.broadcast %cst_14 : f32 to vector<8x64xf32>
    %20 = arith.maximumf %18, %19 : vector<8x64xf32>
    %cst_15 = arith.constant dense<0.000000e+00> : vector<8x64xf32>
    %21 = tpu.matmul %20, %4, %cst_15 {dimension_numbers = #tpu.dot_dimension_numbers<[1], [0], [0], [1], [0, 0, 1, 1], [], []>} : vector<8x64xf32>, vector<64x64xf32>, vector<8x64xf32> -> vector<8x64xf32>
    %22 = math.tanh %21 : vector<8x64xf32>
    %cst_16 = arith.constant dense<0.000000e+00> : vector<8x5xf32>
    %23 = tpu.matmul %22, %5, %cst_16 {dimension_numbers = #tpu.dot_dimension_numbers<[1], [0], [0], [1], [0, 0, 1, 1], [], []>} : vector<8x64xf32>, vector<64x5xf32>, vector<8x5xf32> -> vector<8x5xf32>
    %c0_17 = arith.constant 0 : index
    %c1536 = arith.constant 1536 : index
    %24 = vector.load %arg1[%c0_17, %c1536] : memref<8x5376xf32, #tpu.memory_space<vmem>>, vector<8x768xf32>
    %25 = arith.truncf %24 : vector<8x768xf32> to vector<8x768xbf16>
    %cst_18 = arith.constant dense<0.000000e+00> : vector<8x64xf32>
    %26 = tpu.matmul %25, %0, %cst_18 {dimension_numbers = #tpu.dot_dimension_numbers<[1], [0], [0], [1], [0, 0, 1, 1], [], []>} : vector<8x768xbf16>, vector<768x64xbf16>, vector<8x64xf32> -> vector<8x64xf32>
    %27 = arith.addf %26, %3 : vector<8x64xf32>
    %cst_19 = arith.constant 0.000000e+00 : f32
    %28 = vector.broadcast %cst_19 : f32 to vector<8x64xf32>
    %29 = arith.maximumf %27, %28 : vector<8x64xf32>
    %cst_20 = arith.constant dense<0.000000e+00> : vector<8x64xf32>
    %30 = tpu.matmul %29, %4, %cst_20 {dimension_numbers = #tpu.dot_dimension_numbers<[1], [0], [0], [1], [0, 0, 1, 1], [], []>} : vector<8x64xf32>, vector<64x64xf32>, vector<8x64xf32> -> vector<8x64xf32>
    %31 = math.tanh %30 : vector<8x64xf32>
    %cst_21 = arith.constant dense<0.000000e+00> : vector<8x5xf32>
    %32 = tpu.matmul %31, %5, %cst_21 {dimension_numbers = #tpu.dot_dimension_numbers<[1], [0], [0], [1], [0, 0, 1, 1], [], []>} : vector<8x64xf32>, vector<64x5xf32>, vector<8x5xf32> -> vector<8x5xf32>
    %c0_22 = arith.constant 0 : index
    %c2304 = arith.constant 2304 : index
    %33 = vector.load %arg1[%c0_22, %c2304] : memref<8x5376xf32, #tpu.memory_space<vmem>>, vector<8x768xf32>
    %34 = arith.truncf %33 : vector<8x768xf32> to vector<8x768xbf16>
    %cst_23 = arith.constant dense<0.000000e+00> : vector<8x64xf32>
    %35 = tpu.matmul %34, %0, %cst_23 {dimension_numbers = #tpu.dot_dimension_numbers<[1], [0], [0], [1], [0, 0, 1, 1], [], []>} : vector<8x768xbf16>, vector<768x64xbf16>, vector<8x64xf32> -> vector<8x64xf32>
    %36 = arith.addf %35, %3 : vector<8x64xf32>
    %cst_24 = arith.constant 0.000000e+00 : f32
    %37 = vector.broadcast %cst_24 : f32 to vector<8x64xf32>
    %38 = arith.maximumf %36, %37 : vector<8x64xf32>
    %cst_25 = arith.constant dense<0.000000e+00> : vector<8x64xf32>
    %39 = tpu.matmul %38, %4, %cst_25 {dimension_numbers = #tpu.dot_dimension_numbers<[1], [0], [0], [1], [0, 0, 1, 1], [], []>} : vector<8x64xf32>, vector<64x64xf32>, vector<8x64xf32> -> vector<8x64xf32>
    %40 = math.tanh %39 : vector<8x64xf32>
    %cst_26 = arith.constant dense<0.000000e+00> : vector<8x5xf32>
    %41 = tpu.matmul %40, %5, %cst_26 {dimension_numbers = #tpu.dot_dimension_numbers<[1], [0], [0], [1], [0, 0, 1, 1], [], []>} : vector<8x64xf32>, vector<64x5xf32>, vector<8x5xf32> -> vector<8x5xf32>
    %c0_27 = arith.constant 0 : index
    %c3072 = arith.constant 3072 : index
    %42 = vector.load %arg1[%c0_27, %c3072] : memref<8x5376xf32, #tpu.memory_space<vmem>>, vector<8x768xf32>
    %43 = arith.truncf %42 : vector<8x768xf32> to vector<8x768xbf16>
    %cst_28 = arith.constant dense<0.000000e+00> : vector<8x64xf32>
    %44 = tpu.matmul %43, %0, %cst_28 {dimension_numbers = #tpu.dot_dimension_numbers<[1], [0], [0], [1], [0, 0, 1, 1], [], []>} : vector<8x768xbf16>, vector<768x64xbf16>, vector<8x64xf32> -> vector<8x64xf32>
    %45 = arith.addf %44, %3 : vector<8x64xf32>
    %cst_29 = arith.constant 0.000000e+00 : f32
    %46 = vector.broadcast %cst_29 : f32 to vector<8x64xf32>
    %47 = arith.maximumf %45, %46 : vector<8x64xf32>
    %cst_30 = arith.constant dense<0.000000e+00> : vector<8x64xf32>
    %48 = tpu.matmul %47, %4, %cst_30 {dimension_numbers = #tpu.dot_dimension_numbers<[1], [0], [0], [1], [0, 0, 1, 1], [], []>} : vector<8x64xf32>, vector<64x64xf32>, vector<8x64xf32> -> vector<8x64xf32>
    %49 = math.tanh %48 : vector<8x64xf32>
    %cst_31 = arith.constant dense<0.000000e+00> : vector<8x5xf32>
    %50 = tpu.matmul %49, %5, %cst_31 {dimension_numbers = #tpu.dot_dimension_numbers<[1], [0], [0], [1], [0, 0, 1, 1], [], []>} : vector<8x64xf32>, vector<64x5xf32>, vector<8x5xf32> -> vector<8x5xf32>
    %c0_32 = arith.constant 0 : index
    %c3840 = arith.constant 3840 : index
    %51 = vector.load %arg1[%c0_32, %c3840] : memref<8x5376xf32, #tpu.memory_space<vmem>>, vector<8x768xf32>
    %52 = arith.truncf %51 : vector<8x768xf32> to vector<8x768xbf16>
    %cst_33 = arith.constant dense<0.000000e+00> : vector<8x64xf32>
    %53 = tpu.matmul %52, %0, %cst_33 {dimension_numbers = #tpu.dot_dimension_numbers<[1], [0], [0], [1], [0, 0, 1, 1], [], []>} : vector<8x768xbf16>, vector<768x64xbf16>, vector<8x64xf32> -> vector<8x64xf32>
    %54 = arith.addf %53, %3 : vector<8x64xf32>
    %cst_34 = arith.constant 0.000000e+00 : f32
    %55 = vector.broadcast %cst_34 : f32 to vector<8x64xf32>
    %56 = arith.maximumf %54, %55 : vector<8x64xf32>
    %cst_35 = arith.constant dense<0.000000e+00> : vector<8x64xf32>
    %57 = tpu.matmul %56, %4, %cst_35 {dimension_numbers = #tpu.dot_dimension_numbers<[1], [0], [0], [1], [0, 0, 1, 1], [], []>} : vector<8x64xf32>, vector<64x64xf32>, vector<8x64xf32> -> vector<8x64xf32>
    %58 = math.tanh %57 : vector<8x64xf32>
    %cst_36 = arith.constant dense<0.000000e+00> : vector<8x5xf32>
    %59 = tpu.matmul %58, %5, %cst_36 {dimension_numbers = #tpu.dot_dimension_numbers<[1], [0], [0], [1], [0, 0, 1, 1], [], []>} : vector<8x64xf32>, vector<64x5xf32>, vector<8x5xf32> -> vector<8x5xf32>
    %c0_37 = arith.constant 0 : index
    %c4608 = arith.constant 4608 : index
    %60 = vector.load %arg1[%c0_37, %c4608] : memref<8x5376xf32, #tpu.memory_space<vmem>>, vector<8x768xf32>
    %61 = arith.truncf %60 : vector<8x768xf32> to vector<8x768xbf16>
    %cst_38 = arith.constant dense<0.000000e+00> : vector<8x64xf32>
    %62 = tpu.matmul %61, %0, %cst_38 {dimension_numbers = #tpu.dot_dimension_numbers<[1], [0], [0], [1], [0, 0, 1, 1], [], []>} : vector<8x768xbf16>, vector<768x64xbf16>, vector<8x64xf32> -> vector<8x64xf32>
    %63 = arith.addf %62, %3 : vector<8x64xf32>
    %cst_39 = arith.constant 0.000000e+00 : f32
    %64 = vector.broadcast %cst_39 : f32 to vector<8x64xf32>
    %65 = arith.maximumf %63, %64 : vector<8x64xf32>
    %cst_40 = arith.constant dense<0.000000e+00> : vector<8x64xf32>
    %66 = tpu.matmul %65, %4, %cst_40 {dimension_numbers = #tpu.dot_dimension_numbers<[1], [0], [0], [1], [0, 0, 1, 1], [], []>} : vector<8x64xf32>, vector<64x64xf32>, vector<8x64xf32> -> vector<8x64xf32>
    %67 = math.tanh %66 : vector<8x64xf32>
    %cst_41 = arith.constant dense<0.000000e+00> : vector<8x5xf32>
    %68 = tpu.matmul %67, %5, %cst_41 {dimension_numbers = #tpu.dot_dimension_numbers<[1], [0], [0], [1], [0, 0, 1, 1], [], []>} : vector<8x64xf32>, vector<64x5xf32>, vector<8x5xf32> -> vector<8x5xf32>
    %69 = arith.maximumf %14, %23 : vector<8x5xf32>
    %70 = arith.maximumf %69, %32 : vector<8x5xf32>
    %71 = arith.maximumf %70, %41 : vector<8x5xf32>
    %72 = arith.maximumf %71, %50 : vector<8x5xf32>
    %73 = arith.maximumf %72, %59 : vector<8x5xf32>
    %74 = arith.maximumf %73, %68 : vector<8x5xf32>
    %75 = arith.subf %14, %74 : vector<8x5xf32>
    %76 = math.exp %75 : vector<8x5xf32>
    %77 = arith.subf %23, %74 : vector<8x5xf32>
    %78 = math.exp %77 : vector<8x5xf32>
    %79 = arith.subf %32, %74 : vector<8x5xf32>
    %80 = math.exp %79 : vector<8x5xf32>
    %81 = arith.subf %41, %74 : vector<8x5xf32>
    %82 = math.exp %81 : vector<8x5xf32>
    %83 = arith.subf %50, %74 : vector<8x5xf32>
    %84 = math.exp %83 : vector<8x5xf32>
    %85 = arith.subf %59, %74 : vector<8x5xf32>
    %86 = math.exp %85 : vector<8x5xf32>
    %87 = arith.subf %68, %74 : vector<8x5xf32>
    %88 = math.exp %87 : vector<8x5xf32>
    %89 = arith.addf %76, %78 : vector<8x5xf32>
    %90 = arith.addf %89, %80 : vector<8x5xf32>
    %91 = arith.addf %90, %82 : vector<8x5xf32>
    %92 = arith.addf %91, %84 : vector<8x5xf32>
    %93 = arith.addf %92, %86 : vector<8x5xf32>
    %94 = arith.addf %93, %88 : vector<8x5xf32>
    %95 = tpu.reciprocal %94 : vector<8x5xf32> -> vector<8x5xf32>
    %96 = arith.mulf %76, %95 : vector<8x5xf32>
    %97 = arith.mulf %78, %95 : vector<8x5xf32>
    %98 = arith.mulf %80, %95 : vector<8x5xf32>
    %99 = arith.mulf %82, %95 : vector<8x5xf32>
    %100 = arith.mulf %84, %95 : vector<8x5xf32>
    %101 = arith.mulf %86, %95 : vector<8x5xf32>
    %102 = arith.mulf %88, %95 : vector<8x5xf32>
    %103 = vector.extract_strided_slice %96 {offsets = [0, 0], sizes = [8, 1], strides = [1, 1]} : vector<8x5xf32> to vector<8x1xf32>
    %104 = vector.broadcast %103 : vector<8x1xf32> to vector<8x64xf32>
    %105 = arith.mulf %104, %11 : vector<8x64xf32>
    %106 = vector.extract_strided_slice %97 {offsets = [0, 0], sizes = [8, 1], strides = [1, 1]} : vector<8x5xf32> to vector<8x1xf32>
    %107 = vector.broadcast %106 : vector<8x1xf32> to vector<8x64xf32>
    %108 = arith.mulf %107, %20 : vector<8x64xf32>
    %109 = arith.addf %105, %108 : vector<8x64xf32>
    %110 = vector.extract_strided_slice %98 {offsets = [0, 0], sizes = [8, 1], strides = [1, 1]} : vector<8x5xf32> to vector<8x1xf32>
    %111 = vector.broadcast %110 : vector<8x1xf32> to vector<8x64xf32>
    %112 = arith.mulf %111, %29 : vector<8x64xf32>
    %113 = arith.addf %109, %112 : vector<8x64xf32>
    %114 = vector.extract_strided_slice %99 {offsets = [0, 0], sizes = [8, 1], strides = [1, 1]} : vector<8x5xf32> to vector<8x1xf32>
    %115 = vector.broadcast %114 : vector<8x1xf32> to vector<8x64xf32>
    %116 = arith.mulf %115, %38 : vector<8x64xf32>
    %117 = arith.addf %113, %116 : vector<8x64xf32>
    %118 = vector.extract_strided_slice %100 {offsets = [0, 0], sizes = [8, 1], strides = [1, 1]} : vector<8x5xf32> to vector<8x1xf32>
    %119 = vector.broadcast %118 : vector<8x1xf32> to vector<8x64xf32>
    %120 = arith.mulf %119, %47 : vector<8x64xf32>
    %121 = arith.addf %117, %120 : vector<8x64xf32>
    %122 = vector.extract_strided_slice %101 {offsets = [0, 0], sizes = [8, 1], strides = [1, 1]} : vector<8x5xf32> to vector<8x1xf32>
    %123 = vector.broadcast %122 : vector<8x1xf32> to vector<8x64xf32>
    %124 = arith.mulf %123, %56 : vector<8x64xf32>
    %125 = arith.addf %121, %124 : vector<8x64xf32>
    %126 = vector.extract_strided_slice %102 {offsets = [0, 0], sizes = [8, 1], strides = [1, 1]} : vector<8x5xf32> to vector<8x1xf32>
    %127 = vector.broadcast %126 : vector<8x1xf32> to vector<8x64xf32>
    %128 = arith.mulf %127, %65 : vector<8x64xf32>
    %129 = arith.addf %125, %128 : vector<8x64xf32>
    %130 = vector.extract_strided_slice %96 {offsets = [0, 1], sizes = [8, 1], strides = [1, 1]} : vector<8x5xf32> to vector<8x1xf32>
    %131 = vector.broadcast %130 : vector<8x1xf32> to vector<8x64xf32>
    %132 = arith.mulf %131, %11 : vector<8x64xf32>
    %133 = vector.extract_strided_slice %97 {offsets = [0, 1], sizes = [8, 1], strides = [1, 1]} : vector<8x5xf32> to vector<8x1xf32>
    %134 = vector.broadcast %133 : vector<8x1xf32> to vector<8x64xf32>
    %135 = arith.mulf %134, %20 : vector<8x64xf32>
    %136 = arith.addf %132, %135 : vector<8x64xf32>
    %137 = vector.extract_strided_slice %98 {offsets = [0, 1], sizes = [8, 1], strides = [1, 1]} : vector<8x5xf32> to vector<8x1xf32>
    %138 = vector.broadcast %137 : vector<8x1xf32> to vector<8x64xf32>
    %139 = arith.mulf %138, %29 : vector<8x64xf32>
    %140 = arith.addf %136, %139 : vector<8x64xf32>
    %141 = vector.extract_strided_slice %99 {offsets = [0, 1], sizes = [8, 1], strides = [1, 1]} : vector<8x5xf32> to vector<8x1xf32>
    %142 = vector.broadcast %141 : vector<8x1xf32> to vector<8x64xf32>
    %143 = arith.mulf %142, %38 : vector<8x64xf32>
    %144 = arith.addf %140, %143 : vector<8x64xf32>
    %145 = vector.extract_strided_slice %100 {offsets = [0, 1], sizes = [8, 1], strides = [1, 1]} : vector<8x5xf32> to vector<8x1xf32>
    %146 = vector.broadcast %145 : vector<8x1xf32> to vector<8x64xf32>
    %147 = arith.mulf %146, %47 : vector<8x64xf32>
    %148 = arith.addf %144, %147 : vector<8x64xf32>
    %149 = vector.extract_strided_slice %101 {offsets = [0, 1], sizes = [8, 1], strides = [1, 1]} : vector<8x5xf32> to vector<8x1xf32>
    %150 = vector.broadcast %149 : vector<8x1xf32> to vector<8x64xf32>
    %151 = arith.mulf %150, %56 : vector<8x64xf32>
    %152 = arith.addf %148, %151 : vector<8x64xf32>
    %153 = vector.extract_strided_slice %102 {offsets = [0, 1], sizes = [8, 1], strides = [1, 1]} : vector<8x5xf32> to vector<8x1xf32>
    %154 = vector.broadcast %153 : vector<8x1xf32> to vector<8x64xf32>
    %155 = arith.mulf %154, %65 : vector<8x64xf32>
    %156 = arith.addf %152, %155 : vector<8x64xf32>
    %157 = vector.extract_strided_slice %96 {offsets = [0, 2], sizes = [8, 1], strides = [1, 1]} : vector<8x5xf32> to vector<8x1xf32>
    %158 = vector.broadcast %157 : vector<8x1xf32> to vector<8x64xf32>
    %159 = arith.mulf %158, %11 : vector<8x64xf32>
    %160 = vector.extract_strided_slice %97 {offsets = [0, 2], sizes = [8, 1], strides = [1, 1]} : vector<8x5xf32> to vector<8x1xf32>
    %161 = vector.broadcast %160 : vector<8x1xf32> to vector<8x64xf32>
    %162 = arith.mulf %161, %20 : vector<8x64xf32>
    %163 = arith.addf %159, %162 : vector<8x64xf32>
    %164 = vector.extract_strided_slice %98 {offsets = [0, 2], sizes = [8, 1], strides = [1, 1]} : vector<8x5xf32> to vector<8x1xf32>
    %165 = vector.broadcast %164 : vector<8x1xf32> to vector<8x64xf32>
    %166 = arith.mulf %165, %29 : vector<8x64xf32>
    %167 = arith.addf %163, %166 : vector<8x64xf32>
    %168 = vector.extract_strided_slice %99 {offsets = [0, 2], sizes = [8, 1], strides = [1, 1]} : vector<8x5xf32> to vector<8x1xf32>
    %169 = vector.broadcast %168 : vector<8x1xf32> to vector<8x64xf32>
    %170 = arith.mulf %169, %38 : vector<8x64xf32>
    %171 = arith.addf %167, %170 : vector<8x64xf32>
    %172 = vector.extract_strided_slice %100 {offsets = [0, 2], sizes = [8, 1], strides = [1, 1]} : vector<8x5xf32> to vector<8x1xf32>
    %173 = vector.broadcast %172 : vector<8x1xf32> to vector<8x64xf32>
    %174 = arith.mulf %173, %47 : vector<8x64xf32>
    %175 = arith.addf %171, %174 : vector<8x64xf32>
    %176 = vector.extract_strided_slice %101 {offsets = [0, 2], sizes = [8, 1], strides = [1, 1]} : vector<8x5xf32> to vector<8x1xf32>
    %177 = vector.broadcast %176 : vector<8x1xf32> to vector<8x64xf32>
    %178 = arith.mulf %177, %56 : vector<8x64xf32>
    %179 = arith.addf %175, %178 : vector<8x64xf32>
    %180 = vector.extract_strided_slice %102 {offsets = [0, 2], sizes = [8, 1], strides = [1, 1]} : vector<8x5xf32> to vector<8x1xf32>
    %181 = vector.broadcast %180 : vector<8x1xf32> to vector<8x64xf32>
    %182 = arith.mulf %181, %65 : vector<8x64xf32>
    %183 = arith.addf %179, %182 : vector<8x64xf32>
    %184 = vector.extract_strided_slice %96 {offsets = [0, 3], sizes = [8, 1], strides = [1, 1]} : vector<8x5xf32> to vector<8x1xf32>
    %185 = vector.broadcast %184 : vector<8x1xf32> to vector<8x64xf32>
    %186 = arith.mulf %185, %11 : vector<8x64xf32>
    %187 = vector.extract_strided_slice %97 {offsets = [0, 3], sizes = [8, 1], strides = [1, 1]} : vector<8x5xf32> to vector<8x1xf32>
    %188 = vector.broadcast %187 : vector<8x1xf32> to vector<8x64xf32>
    %189 = arith.mulf %188, %20 : vector<8x64xf32>
    %190 = arith.addf %186, %189 : vector<8x64xf32>
    %191 = vector.extract_strided_slice %98 {offsets = [0, 3], sizes = [8, 1], strides = [1, 1]} : vector<8x5xf32> to vector<8x1xf32>
    %192 = vector.broadcast %191 : vector<8x1xf32> to vector<8x64xf32>
    %193 = arith.mulf %192, %29 : vector<8x64xf32>
    %194 = arith.addf %190, %193 : vector<8x64xf32>
    %195 = vector.extract_strided_slice %99 {offsets = [0, 3], sizes = [8, 1], strides = [1, 1]} : vector<8x5xf32> to vector<8x1xf32>
    %196 = vector.broadcast %195 : vector<8x1xf32> to vector<8x64xf32>
    %197 = arith.mulf %196, %38 : vector<8x64xf32>
    %198 = arith.addf %194, %197 : vector<8x64xf32>
    %199 = vector.extract_strided_slice %100 {offsets = [0, 3], sizes = [8, 1], strides = [1, 1]} : vector<8x5xf32> to vector<8x1xf32>
    %200 = vector.broadcast %199 : vector<8x1xf32> to vector<8x64xf32>
    %201 = arith.mulf %200, %47 : vector<8x64xf32>
    %202 = arith.addf %198, %201 : vector<8x64xf32>
    %203 = vector.extract_strided_slice %101 {offsets = [0, 3], sizes = [8, 1], strides = [1, 1]} : vector<8x5xf32> to vector<8x1xf32>
    %204 = vector.broadcast %203 : vector<8x1xf32> to vector<8x64xf32>
    %205 = arith.mulf %204, %56 : vector<8x64xf32>
    %206 = arith.addf %202, %205 : vector<8x64xf32>
    %207 = vector.extract_strided_slice %102 {offsets = [0, 3], sizes = [8, 1], strides = [1, 1]} : vector<8x5xf32> to vector<8x1xf32>
    %208 = vector.broadcast %207 : vector<8x1xf32> to vector<8x64xf32>
    %209 = arith.mulf %208, %65 : vector<8x64xf32>
    %210 = arith.addf %206, %209 : vector<8x64xf32>
    %211 = vector.extract_strided_slice %96 {offsets = [0, 4], sizes = [8, 1], strides = [1, 1]} : vector<8x5xf32> to vector<8x1xf32>
    %212 = vector.broadcast %211 : vector<8x1xf32> to vector<8x64xf32>
    %213 = arith.mulf %212, %11 : vector<8x64xf32>
    %214 = vector.extract_strided_slice %97 {offsets = [0, 4], sizes = [8, 1], strides = [1, 1]} : vector<8x5xf32> to vector<8x1xf32>
    %215 = vector.broadcast %214 : vector<8x1xf32> to vector<8x64xf32>
    %216 = arith.mulf %215, %20 : vector<8x64xf32>
    %217 = arith.addf %213, %216 : vector<8x64xf32>
    %218 = vector.extract_strided_slice %98 {offsets = [0, 4], sizes = [8, 1], strides = [1, 1]} : vector<8x5xf32> to vector<8x1xf32>
    %219 = vector.broadcast %218 : vector<8x1xf32> to vector<8x64xf32>
    %220 = arith.mulf %219, %29 : vector<8x64xf32>
    %221 = arith.addf %217, %220 : vector<8x64xf32>
    %222 = vector.extract_strided_slice %99 {offsets = [0, 4], sizes = [8, 1], strides = [1, 1]} : vector<8x5xf32> to vector<8x1xf32>
    %223 = vector.broadcast %222 : vector<8x1xf32> to vector<8x64xf32>
    %224 = arith.mulf %223, %38 : vector<8x64xf32>
    %225 = arith.addf %221, %224 : vector<8x64xf32>
    %226 = vector.extract_strided_slice %100 {offsets = [0, 4], sizes = [8, 1], strides = [1, 1]} : vector<8x5xf32> to vector<8x1xf32>
    %227 = vector.broadcast %226 : vector<8x1xf32> to vector<8x64xf32>
    %228 = arith.mulf %227, %47 : vector<8x64xf32>
    %229 = arith.addf %225, %228 : vector<8x64xf32>
    %230 = vector.extract_strided_slice %101 {offsets = [0, 4], sizes = [8, 1], strides = [1, 1]} : vector<8x5xf32> to vector<8x1xf32>
    %231 = vector.broadcast %230 : vector<8x1xf32> to vector<8x64xf32>
    %232 = arith.mulf %231, %56 : vector<8x64xf32>
    %233 = arith.addf %229, %232 : vector<8x64xf32>
    %234 = vector.extract_strided_slice %102 {offsets = [0, 4], sizes = [8, 1], strides = [1, 1]} : vector<8x5xf32> to vector<8x1xf32>
    %235 = vector.broadcast %234 : vector<8x1xf32> to vector<8x64xf32>
    %236 = arith.mulf %235, %65 : vector<8x64xf32>
    %237 = arith.addf %233, %236 : vector<8x64xf32>
    %cst_42 = arith.constant 0.000000e+00 : f32
    %238 = vector.broadcast %cst_42 : f32 to vector<8x29xf32>
    %239 = tpu.concatenate %129, %156, %183, %210, %237, %96, %97, %98, %99, %100, %101, %102, %238 in 1 : vector<8x64xf32>, vector<8x64xf32>, vector<8x64xf32>, vector<8x64xf32>, vector<8x64xf32>, vector<8x5xf32>, vector<8x5xf32>, vector<8x5xf32>, vector<8x5xf32>, vector<8x5xf32>, vector<8x5xf32>, vector<8x5xf32>, vector<8x29xf32> -> vector<8x384xf32>
    %c0_43 = arith.constant 0 : index
    %c0_44 = arith.constant 0 : index
    %240 = vector.load %arg6[%c0_43, %c0_44] : memref<8x384xf32, #tpu.memory_space<vmem>>, vector<8x384xf32>
    tpu.vector_store %arg6[%c0_43, %c0_44], %239 {strides = array<i32>} : memref<8x384xf32, #tpu.memory_space<vmem>>, vector<8x384xf32>,
    return
  }
  func.func @transform_0(%arg0: i32) -> (i32, i32) {
    %c0_i32 = arith.constant 0 : i32
    %c0_i32_0 = arith.constant 0 : i32
    return %arg0, %c0_i32 : i32, i32
  }
  func.func @transform_1(%arg0: i32) -> (i32, i32) {
    %c0_i32 = arith.constant 0 : i32
    %c0_i32_0 = arith.constant 0 : i32
    %c0_i32_1 = arith.constant 0 : i32
    return %c0_i32, %c0_i32_0 : i32, i32
  }
  func.func @transform_2(%arg0: i32) -> (i32, i32) {
    %c0_i32 = arith.constant 0 : i32
    %c0_i32_0 = arith.constant 0 : i32
    %c0_i32_1 = arith.constant 0 : i32
    return %c0_i32, %c0_i32_0 : i32, i32
  }
  func.func @transform_3(%arg0: i32) -> (i32, i32) {
    %c0_i32 = arith.constant 0 : i32
    %c0_i32_0 = arith.constant 0 : i32
    %c0_i32_1 = arith.constant 0 : i32
    return %c0_i32, %c0_i32_0 : i32, i32
  }
  func.func @transform_4(%arg0: i32) -> (i32, i32) {
    %c0_i32 = arith.constant 0 : i32
    %c0_i32_0 = arith.constant 0 : i32
    %c0_i32_1 = arith.constant 0 : i32
    return %c0_i32, %c0_i32_0 : i32, i32
  }
  func.func @transform_5(%arg0: i32) -> (i32, i32) {
    %c0_i32 = arith.constant 0 : i32
    %c0_i32_0 = arith.constant 0 : i32
    return %arg0, %c0_i32 : i32, i32
  }
}

</mosaic_0001>

<bundles_post_ra>
// kernel: time_async.1
= control target key start
LH: loop header
LB: loop body
LE: loop exit
PB: predicated region body
PF: predicated region fallthrough
CT: control target
= control target key end

     0   :  { %vm552_vm0 = vcmask 523264   ;;  %s2416_s8 = smov 79   ;;  %s2417_s9 = smov 74   ;;  %vm1948_vm5 = vcmask 564224   ;;  %vm1950_vm6 = vcmask 605184   ;;  %vm1952_vm7 = vcmask 646144   ;;  %s3815_s0 = inlined_call_operand.vmem [shape: f32[2,5376], index: 0, kind: input, shape index: {}]   ;;  %s3816_s1 = inlined_call_operand.vmem [shape: bf16[768,64], index: 1, kind: input, shape index: {}]   ;;  %s3817_s2 = inlined_call_operand.vmem [shape: f32[1,64], index: 2, kind: input, shape index: {}]   ;;  %s3818_s3 = inlined_call_operand.vmem [shape: f32[64,64], index: 3, kind: input, shape index: {}]   ;;  %s3819_s4 = inlined_call_operand.vmem [shape: f32[64,5], index: 4, kind: input, shape index: {}]   ;;  %s3820_s5 = inlined_call_operand.vmem [shape: f32[2,384], index: 5, kind: output, shape index: {}]  }
   0x1   :  { %v2455_v0 = vld [vmem:[%s3816_s1 + $0x38] sm:$0xff]  ;;  %v2467_v2 = vld [vmem:[%s3816_s1 + $0x30] sm:$0xff]  ;;  %v2501_v8 = vld [vmem:[%s3816_s1 + $0x28] sm:$0xff]  ;;  %s2418_s10 = smov 69   ;;  %s2420_s11 = smov 84   ;;  %vm1954_vm8 = vcmask 687104  }
   0x2   :  { %3873 = vst [vmem:[#allocation3_spill] sm:$0xff] %v2455_v0  ;;  %v2460_v1 = vld [vmem:[%s3816_s1 + $0x78] sm:$0xff]  ;;  %473 = vmatpush.bf16.msra.mxu0 %v2455_v0  ;;  %v2472_v3 = vld [vmem:[%s3816_s1 + $0x70] sm:$0xff]  ;;  %v2506_v9 = vld [vmem:[%s3816_s1 + $0x68] sm:$0xff]  ;;  %s2421_s12 = smov 94   ;;  %vm1956_vm9 = vcmask 728064  }
   0x3   :  { %486 = vmatpush.bf16.msra.mxu1 %v2460_v1  ;;  %3874 = vst [vmem:[#allocation4_spill] sm:$0xff] %v2467_v2  ;;  %v2477_v4 = vld [vmem:[%s3816_s1 + $0xb8] sm:$0xff]  ;;  %v2488_v6 = vld [vmem:[%s3816_s1 + $0xb0] sm:$0xff]  ;;  %v2512_v10 = vld [vmem:[%s3816_s1 + $0xa8] sm:$0xff]  ;;  %vm1958_vm10 = vcmask 769024   ;;  %vm1960_vm11 = vcmask 809984  }
   0x4   :  { %v2482_v5 = vld [vmem:[%s3816_s1 + $0xf8] sm:$0xff]  ;;  %499 = vmatpush.bf16.msra.mxu2 %v2477_v4  ;;  %v2494_v7 = vld [vmem:[%s3816_s1 + $0xf0] sm:$0xff]  ;;  %3875 = vst [vmem:[#allocation5_spill] sm:$0xff] %v2501_v8  ;;  %v2518_v11 = vld [vmem:[%s3816_s1 + $0xe8] sm:$0xff]  ;;  %vm1967_vm12 = vcmask 1041408   ;;  %vm1969_vm13 = vcmask 1043456  }
   0x5   :  { %512 = vmatpush.bf16.msra.mxu3 %v2482_v5  ;;  %3876 = vst [vmem:[#allocation6_spill] sm:$0xff] %v2518_v11  ;;  %v2525_v12 = vld [vmem:[%s3816_s1 + $0x20] sm:$0xff]  ;;  %v138_v15 = vld [vmem:[%s3815_s0 + $0x54] sm:$0xff]  ;;  %v140_v16 = vld [vmem:[%s3815_s0 + $0xa8] sm:$0xff] }
   0x6   :  { %474 = vmatpush.bf16.msra.mxu0 %v2467_v2  ;;  %3877 = vst [vmem:[#allocation7_spill] sm:$0xff] %v2525_v12  ;;  %v2530_v13 = vld [vmem:[%s3816_s1 + $0x60] sm:$0xff]  ;;  %v2561_v20 = vld [vmem:[%s3816_s1 + $0x18] sm:$0xff]  ;;  %v2585_v24 = vld [vmem:[%s3816_s1 + $0x10] sm:$0xff] }
   0x7   :  { %487 = vmatpush.bf16.msra.mxu1 %v2472_v3  ;;  %v136_v14 = vld [vmem:[%s3815_s0] sm:$0xff]  ;;  %154 = vst [vmem:[#allocation1 + $0x1] ss:$4 sm:$0xff] %v138_v15  ;;  %v2566_v21 = vld [vmem:[%s3816_s1 + $0x58] sm:$0xff]  ;;  %v2590_v25 = vld [vmem:[%s3816_s1 + $0x50] sm:$0xff] }
   0x8   :  { %500 = vmatpush.bf16.msra.mxu2 %v2488_v6  ;;  %v2545_v17 = vld [vmem:[%s3816_s1 + $0xa0] sm:$0xff]  ;;  %152 = vst [vmem:[#allocation1] ss:$4 sm:$0xff] %v136_v14  ;;  %v2572_v22 = vld [vmem:[%s3816_s1 + $0x98] sm:$0xff]  ;;  %v137_v26 = vld [vmem:[%s3815_s0 + $0x8] sm:$0xf] }
   0x9   :  { %513 = vmatpush.bf16.msra.mxu3 %v2494_v7  ;;  %v142_v18 = vld [vmem:[%s3815_s0 + $0xfc] sm:$0xff]  ;;  %156 = vst [vmem:[#allocation1 + $0x2] ss:$4 sm:$0xff] %v140_v16  ;;  %v2602_v28 = vld [vmem:[%s3816_s1 + $0x90] sm:$0xff]  ;;  %v2618_v31 = vld [vmem:[%s3816_s1 + $0x8] sm:$0xff] }
   0xa   :  { %475 = vmatpush.bf16.msra.mxu0 %v2501_v8  ;;  %v2554_v19 = vld [vmem:[%s3816_s1 + $0xe0] sm:$0xff]  ;;  %158 = vst [vmem:[#allocation1 + $0x3] ss:$4 sm:$0xff] %v142_v18  ;;  %v2578_v23 = vld [vmem:[%s3816_s1 + $0xd8] sm:$0xff]  ;;  %v2608_v29 = vld [vmem:[%s3816_s1 + $0xd0] sm:$0xff] }
   0xb   :  { %488 = vmatpush.bf16.msra.mxu1 %v2506_v9  ;;  %3878 = vst [vmem:[#allocation8_spill] sm:$0xff] %v2554_v19  ;;  %v139_v27 = vld [vmem:[%s3815_s0 + $0x5c] sm:$0xf]  ;;  %v141_v30 = vld [vmem:[%s3815_s0 + $0xb0] sm:$0xf]  ;;  %v2623_v32 = vld [vmem:[%s3816_s1 + $0x48] sm:$0xff] }
   0xc   :  { %501 = vmatpush.bf16.msra.mxu2 %v2512_v10  ;;  %3879 = vst [vmem:[#allocation9_spill] sm:$0xff] %v2578_v23  ;;  %v143_v33 = vld [vmem:[%s3815_s0 + $0x104] sm:$0xf]  ;;  %v2632_v34 = vld [vmem:[%s3816_s1 + $0x88] sm:$0xff]  ;;  %v2655_v40 = vld [vmem:[%s3816_s1 + $0x138] sm:$0xff] }
   0xd   :  { %514 = vmatpush.bf16.msra.mxu3 %v2518_v11  ;;  %160 = vst [vmem:[#allocation1 + $0x20] ss:$4 sm:$0xff] %v137_v26  ;;  %v2637_v35 = vld [vmem:[%s3816_s1] sm:$0xff]  ;;  %v2648_v37 = vld [vmem:[%s3816_s1 + $0xc8] sm:$0xff]  ;;  %v2660_v41 = vld [vmem:[%s3816_s1 + $0x178] sm:$0xff] }
   0xe   :  { %476 = vmatpush.bf16.msra.mxu0 %v2525_v12  ;;  %3880 = vst [vmem:[#allocation10_spill] sm:$0xff] %v2608_v29  ;;  %v2642_v36 = vld [vmem:[%s3816_s1 + $0x40] sm:$0xff]  ;;  %v2681_v48 = vld [vmem:[%s3816_s1 + $0x130] sm:$0xff]  ;;  %v2695_v52 = vld [vmem:[%s3816_s1 + $0x128] sm:$0xff] }
   0xf   :  { %489 = vmatpush.bf16.msra.mxu1 %v2530_v13  ;;  %162 = vst [vmem:[#allocation1 + $0x21] ss:$4 sm:$0xff] %v139_v27  ;;  %v2666_v42 = vld [vmem:[%s3816_s1 + $0x80] sm:$0xff]  ;;  %v2686_v49 = vld [vmem:[%s3816_s1 + $0x170] sm:$0xff]  ;;  %v2700_v53 = vld [vmem:[%s3816_s1 + $0x168] sm:$0xff] }
  0x10   :  { %502 = vmatpush.bf16.msra.mxu2 %v2545_v17  ;;  %164 = vst [vmem:[#allocation1 + $0x22] ss:$4 sm:$0xff] %v141_v30  ;;  %v2674_v46 = vld [vmem:[%s3816_s1 + $0xc0] sm:$0xff]  ;;  %v2719_v56 = vld [vmem:[%s3816_s1 + $0x118] sm:$0xff]  ;;  %v2731_v58 = vld [vmem:[%s3816_s1 + $0x110] sm:$0xff] }
  0x11   :  { %515 = vmatpush.bf16.msra.mxu3 %v2554_v19  ;;  %3881 = vst [vmem:[#allocation11_spill] sm:$0xff] %v2648_v37  ;;  %v167_v38 = vld.sshfl [vmem:[#allocation1] sm:$0xff pattern:$0x73625140]  ;;  %v2724_v57 = vld [vmem:[%s3816_s1 + $0x158] sm:$0xff]  ;;  %v2736_v59 = vld [vmem:[%s3816_s1 + $0x150] sm:$0xff] }
  0x12   :  { %477 = vmatpush.bf16.msra.mxu0 %v2561_v20  ;;  %166 = vst [vmem:[#allocation1 + $0x23] ss:$4 sm:$0xff] %v143_v33  ;;  %v168_v39 = vld.sshfl [vmem:[#allocation1 + $0x8] sm:$0xff pattern:$0x73625140]  ;;  %v179_v43 = vpack.c.bf16 %v167_v38, %v167_v38  ;;  %v2707_v54 = vld [vmem:[%s3816_s1 + $0x120] sm:$0xff] }
  0x13   :  { %490 = vmatpush.bf16.msra.mxu1 %v2566_v21  ;;  %3882 = vst [vmem:[#allocation12_spill] sm:$0xff] %v2655_v40  ;;  %v180_v44 = vpack.c.bf16 %v168_v39, %v168_v39  ;;  %v169_v45 = vld.sshfl [vmem:[#allocation1 + $0x10] sm:$0xff pattern:$0x73625140]  ;;  %v2712_v55 = vld [vmem:[%s3816_s1 + $0x160] sm:$0xff]  ;;  %v2743_v60 = vld [vmem:[%s3816_s1 + $0x108] sm:$0xff] }
  0x14   :  { %503 = vmatpush.bf16.msra.mxu2 %v2572_v22  ;;  %3883 = vst [vmem:[#allocation13_spill] sm:$0xff] %v2660_v41  ;;  %v170_v47 = vld.sshfl [vmem:[#allocation1 + $0x18] sm:$0xff pattern:$0x73625140]  ;;  %v181_v50 = vpack.c.bf16 %v169_v45, %v169_v45  ;;  %v2748_v61 = vld [vmem:[%s3816_s1 + $0x148] sm:$0xff]  ;;  %v2753_v62 = vld [vmem:[%s3816_s1 + $0x100] sm:$0xff] }
  0x15   :  { %516 = vmatpush.bf16.msra.mxu3 %v2578_v23  ;;  %3884 = vst [vmem:[#allocation14_spill] sm:$0xff] %v2674_v46  ;;  %v182_v51 = vpack.c.bf16 %v170_v47, %v170_v47  ;;  %v2758_v63 = vld [vmem:[%s3816_s1 + $0x140] sm:$0xff]  ;;  %v2799_v26 = vld [vmem:[%s3818_s3 + $0x38] sm:$0xff]  ;;  %v2804_v27 = vld [vmem:[%s3818_s3 + $0x30] sm:$0xff] }
  0x16   :  { %478 = vmatpush.bf16.msra.mxu0 %v2585_v24  ;;  %3885 = vst [vmem:[#allocation15_spill] sm:$0xff] %v2681_v48  ;;  %v2810_v30 = vld [vmem:[%s3818_s3 + $0x28] sm:$0xff]  ;;  %v2817_v33 = vld [vmem:[%s3818_s3 + $0x20] sm:$0xff]  ;;  %v2822_v38 = vld [vmem:[%s3818_s3 + $0x18] sm:$0xff] }
  0x17   :  { %491 = vmatpush.bf16.msra.mxu1 %v2590_v25  ;;  %3886 = vst [vmem:[#allocation16_spill] sm:$0xff] %v2686_v49  ;;  %v2829_v39 = vld [vmem:[%s3818_s3 + $0x10] sm:$0xff]  ;;  %v2835_v45 = vld [vmem:[%s3818_s3 + $0x8] sm:$0xff]  ;;  %v2841_v47 = vld [vmem:[%s3818_s3] sm:$0xff] }
  0x18   :  { %504 = vmatpush.bf16.msra.mxu2 %v2602_v28  ;;  %3887 = vst [vmem:[#allocation17_spill] sm:$0xff] %v2695_v52 }
  0x19   :  { %517 = vmatpush.bf16.msra.mxu3 %v2608_v29  ;;  %3888 = vst [vmem:[#allocation18_spill] sm:$0xff] %v2700_v53  ;;  %v171_v14 = vld.sshfl [vmem:[#allocation1 + $0x20] sm:$0xff pattern:$0x73625140] }
  0x1a   :  { %479 = vmatpush.bf16.msra.mxu0 %v2618_v31  ;;  %3889 = vst [vmem:[#allocation19_spill] sm:$0xff] %v2707_v54  ;;  %v172_v15 = vld.sshfl [vmem:[#allocation1 + $0x28] sm:$0xff pattern:$0x73625140]  ;;  %v183_v16 = vpack.c.bf16 %v171_v14, %v171_v14 }
  0x1b   :  { %492 = vmatpush.bf16.msra.mxu1 %v2623_v32  ;;  %3890 = vst [vmem:[#allocation20_spill] sm:$0xff] %v2712_v55  ;;  %v184_v18 = vpack.c.bf16 %v172_v15, %v172_v15  ;;  %v2859_v14 = vld [vmem:[%s3819_s4 + $0x28] sm:$0xff] }
  0x1c   :  { %505 = vmatpush.bf16.msra.mxu2 %v2632_v34  ;;  %3891 = vst [vmem:[#allocation21_spill] sm:$0xff] %v2719_v56 }
  0x1d   :  { %518 = vmatpush.bf16.msra.mxu3 %v2648_v37  ;;  %3892 = vst [vmem:[#allocation22_spill] sm:$0xff] %v2724_v57 }
  0x1e   :  { %480 = vmatpush.bf16.msra.mxu0 %v2637_v35  ;;  %3893 = vst [vmem:[#allocation23_spill] sm:$0xff] %v2731_v58 }
  0x1f   :  { %493 = vmatpush.bf16.msra.mxu1 %v2642_v36  ;;  %3894 = vst [vmem:[#allocation24_spill] sm:$0xff] %v2736_v59 }
  0x20   :  { %506 = vmatpush.bf16.msra.mxu2 %v2666_v42  ;;  %3895 = vst [vmem:[#allocation25_spill] sm:$0xff] %v2743_v60 }
  0x21   :  { %481 = vmatmul.bf16.vlgmr.msra.gmra.mxu0 %v179_v43  ;;  %519 = vmatpush.bf16.msra.mxu3 %v2674_v46  ;;  %3896 = vst [vmem:[#allocation26_spill] sm:$0xff] %v2748_v61 }
  0x22   :  { %525 = vmatpush.bf16.msrb.mxu0 %v2655_v40  ;;  %494 = vmatmul.bf16.vlgmr.msra.gmra.mxu1 %v180_v44  ;;  %3897 = vst [vmem:[#allocation27_spill] sm:$0xff] %v2753_v62 }
  0x23   :  { %538 = vmatpush.bf16.msrb.mxu1 %v2660_v41  ;;  %507 = vmatmul.bf16.vlgmr.msra.gmra.mxu2 %v181_v50  ;;  %3898 = vst [vmem:[#allocation28_spill] sm:$0xff] %v2758_v63  ;;  %v2848_v50 = vld [vmem:[%s3819_s4 + $0x38] sm:$0xff] }
  0x24   :  { %520 = vmatmul.bf16.vlgmr.msra.gmra.mxu3 %v182_v51  ;;  %564 = vmatpush.msrb.mxu2 %v2799_v26  ;;  %v2853_v51 = vld [vmem:[%s3819_s4 + $0x30] sm:$0xff] }
  0x25   :  { %588 = vmatpush.msrb.mxu3 %v2848_v50 }
  0x26   :  { %526 = vmatpush.bf16.msrb.mxu0 %v2681_v48  ;;  %565 = vmatpush.msrb.mxu2 %v2804_v27 }
  0x27   :  { %539 = vmatpush.bf16.msrb.mxu1 %v2686_v49  ;;  %589 = vmatpush.msrb.mxu3 %v2853_v51 }
  0x28   :  { %566 = vmatpush.msrb.mxu2 %v2810_v30 }
  0x29   :  { %590 = vmatpush.msrb.mxu3 %v2859_v14 }
  0x2a   :  { %527 = vmatpush.bf16.msrb.mxu0 %v2695_v52  ;;  %567 = vmatpush.msrb.mxu2 %v2817_v33 }
  0x2b   :  { %540 = vmatpush.bf16.msrb.mxu1 %v2700_v53 }
  0x2c   :  { %568 = vmatpush.msrb.mxu2 %v2822_v38 }
  0x2e   :  { %528 = vmatpush.bf16.msrb.mxu0 %v2707_v54  ;;  %569 = vmatpush.msrb.mxu2 %v2829_v39 }
  0x2f   :  { %541 = vmatpush.bf16.msrb.mxu1 %v2712_v55 }
  0x30   :  { %570 = vmatpush.msrb.mxu2 %v2835_v45 }
  0x32   :  { %529 = vmatpush.bf16.msrb.mxu0 %v2719_v56  ;;  %571 = vmatpush.msrb.mxu2 %v2841_v47 }
  0x33   :  { %542 = vmatpush.bf16.msrb.mxu1 %v2724_v57 }
  0x34   :  { %649 = vmatpush.bf16.msra.mxu2 %v2455_v0 }
  0x36   :  { %530 = vmatpush.bf16.msrb.mxu0 %v2731_v58 }
  0x37   :  { %543 = vmatpush.bf16.msrb.mxu1 %v2736_v59 }
  0x38   :  { %650 = vmatpush.bf16.msra.mxu2 %v2467_v2 }
  0x3a   :  { %531 = vmatpush.bf16.msrb.mxu0 %v2743_v60 }
  0x3b   :  { %544 = vmatpush.bf16.msrb.mxu1 %v2748_v61 }
  0x3c   :  { %651 = vmatpush.bf16.msra.mxu2 %v2501_v8 }
  0x3e   :  { %532 = vmatpush.bf16.msrb.mxu0 %v2753_v62 }
  0x3f   :  { %545 = vmatpush.bf16.msrb.mxu1 %v2758_v63 }
  0x40   :  { %652 = vmatpush.bf16.msra.mxu2 %v2525_v12 }
  0x41   :  { %533 = vmatmul.bf16.vlgmr.msrb.gmra.mxu0 %v183_v16 }
  0x42   :  { %675 = vmatpush.bf16.msra.mxu0 %v2477_v4  ;;  %546 = vmatmul.bf16.vlgmr.msrb.gmra.mxu1 %v184_v18 }
  0x43   :  { %688 = vmatpush.bf16.msra.mxu1 %v2482_v5 }
  0x44   :  { %653 = vmatpush.bf16.msra.mxu2 %v2561_v20 }
  0x46   :  { %676 = vmatpush.bf16.msra.mxu0 %v2488_v6 }
  0x47   :  { %689 = vmatpush.bf16.msra.mxu1 %v2494_v7 }
  0x48   :  { %654 = vmatpush.bf16.msra.mxu2 %v2585_v24 }
  0x4a   :  { %677 = vmatpush.bf16.msra.mxu0 %v2512_v10 }
  0x4b   :  { %690 = vmatpush.bf16.msra.mxu1 %v2518_v11 }
  0x4c   :  { %655 = vmatpush.bf16.msra.mxu2 %v2618_v31 }
  0x4e   :  { %678 = vmatpush.bf16.msra.mxu0 %v2545_v17 }
  0x4f   :  { %691 = vmatpush.bf16.msra.mxu1 %v2554_v19 }
  0x50   :  { %656 = vmatpush.bf16.msra.mxu2 %v2637_v35 }
  0x52   :  { %679 = vmatpush.bf16.msra.mxu0 %v2572_v22 }
  0x53   :  { %692 = vmatpush.bf16.msra.mxu1 %v2578_v23 }
  0x56   :  { %680 = vmatpush.bf16.msra.mxu0 %v2602_v28 }
  0x57   :  { %693 = vmatpush.bf16.msra.mxu1 %v2608_v29 }
  0x5a   :  { %681 = vmatpush.bf16.msra.mxu0 %v2632_v34 }
  0x5b   :  { %694 = vmatpush.bf16.msra.mxu1 %v2648_v37  ;;  %v2872_v37 = vld [vmem:[%s3819_s4 + $0x18] sm:$0xff] }
  0x5e   :  { %682 = vmatpush.bf16.msra.mxu0 %v2666_v42 }
  0x5f   :  { %695 = vmatpush.bf16.msra.mxu1 %v2674_v46 }
  0x62   :  { %824 = vmatpush.bf16.msrb.mxu0 %v2455_v0  ;;  %v2866_v0 = vld [vmem:[%s3819_s4 + $0x20] sm:$0xff] }
  0x63   :  { %837 = vmatpush.bf16.msrb.mxu1 %v2460_v1  ;;  %591 = vmatpush.msrb.mxu3 %v2866_v0 }
  0x65   :  { %592 = vmatpush.msrb.mxu3 %v2872_v37 }
  0x66   :  { %825 = vmatpush.bf16.msrb.mxu0 %v2467_v2  ;;  %v2890_v2 = vld [vmem:[%s3819_s4 + $0x8] sm:$0xff] }
  0x67   :  { %838 = vmatpush.bf16.msrb.mxu1 %v2472_v3 }
  0x6a   :  { %826 = vmatpush.bf16.msrb.mxu0 %v2501_v8  ;;  %v2898_v8 = vld [vmem:[%s3819_s4] sm:$0xff] }
  0x6b   :  { %839 = vmatpush.bf16.msrb.mxu1 %v2506_v9 }
  0x6e   :  { %827 = vmatpush.bf16.msrb.mxu0 %v2525_v12 }
  0x6f   :  { %840 = vmatpush.bf16.msrb.mxu1 %v2530_v13 }
  0x72   :  { %828 = vmatpush.bf16.msrb.mxu0 %v2561_v20 }
  0x73   :  { %841 = vmatpush.bf16.msrb.mxu1 %v2566_v21 }
  0x76   :  { %829 = vmatpush.bf16.msrb.mxu0 %v2585_v24 }
  0x77   :  { %842 = vmatpush.bf16.msrb.mxu1 %v2590_v25 }
  0x7a   :  { %830 = vmatpush.bf16.msrb.mxu0 %v2618_v31 }
  0x7b   :  { %843 = vmatpush.bf16.msrb.mxu1 %v2623_v32 }
  0x7e   :  { %831 = vmatpush.bf16.msrb.mxu0 %v2637_v35 }
  0x7f   :  { %844 = vmatpush.bf16.msrb.mxu1 %v2642_v36 }
  0x9e   :  { %v482_v43 = vpop.f32.mrf.mxu0 }
  0x9f   :  { %v495_v44 = vpop.f32.mrf.mxu1 }
  0xa6   :  { %v484_v15 = vpop.f32.mrf.mxu0  ;;  %v508_v18 = vpop.f32.mrf.mxu2 }
  0xa7   :  { %v497_v16 = vpop.f32.mrf.mxu1  ;;  %v521_v46 = vpop.f32.mrf.mxu3  ;;  %v2877_v15 = vld [vmem:[%s3817_s2] ss:$0 sm:$0xff] }
  0xa8   :  { %3899 = vst [vmem:[#allocation29_spill] sm:$0xff] %v2877_v15  ;;  %v2884_v16 = vld [vmem:[%s3819_s4 + $0x10] sm:$0xff]  ;;  %v483_v29 = vadd.f32 %v2877_v15, %v482_v43 }
  0xa9   :  { %593 = vmatpush.msrb.mxu3 %v2884_v16 }
  0xaa   :  { %v496_v11 = vadd.f32 %v495_v44, %v483_v29 }
  0xab   :  { %594 = vmatpush.msrb.mxu3 %v2890_v2 }
  0xac   :  { %v509_v43 = vadd.f32 %v508_v18, %v496_v11  ;;  %v602_v18 = vld [vmem:[%s3815_s0 + $0x60] sm:$0xff] }
  0xad   :  { %595 = vmatpush.msrb.mxu3 %v2898_v8  ;;  %618 = vst [vmem:[#allocation1 + $0x1] ss:$4 sm:$0xff] %v602_v18 }
  0xae   :  { %v510_v23 = vpop.f32.mrf.mxu2 }
  0xaf   :  { %v523_v19 = vpop.f32.mrf.mxu3  ;;  %662 = vmatpush.bf16.msra.mxu3 %v2460_v1  ;;  %v522_v23 = vadd.f32 %v521_v46, %v509_v43  ;;  %v606_v43 = vld [vmem:[%s3815_s0 + $0x108] sm:$0xff] }
  0xb0   :  { %622 = vst [vmem:[#allocation1 + $0x3] ss:$4 sm:$0xff] %v606_v43 }
  0xb3   :  { %663 = vmatpush.bf16.msra.mxu3 %v2472_v3 }
  0xb7   :  { %664 = vmatpush.bf16.msra.mxu3 %v2506_v9 }
  0xbb   :  { %665 = vmatpush.bf16.msra.mxu3 %v2530_v13 }
  0xbe   :  { %v534_v12 = vpop.f32.mrf.mxu0 }
  0xbf   :  { %v547_v15 = vpop.f32.mrf.mxu1  ;;  %v535_v19 = vadd.f32 %v534_v12, %v522_v23  ;;  %666 = vmatpush.bf16.msra.mxu3 %v2566_v21  ;;  %v600_v12 = vld [vmem:[%s3815_s0 + $0xc] sm:$0xff] }
  0xc0   :  { %616 = vst [vmem:[#allocation1] ss:$4 sm:$0xff] %v600_v12  ;;  %v607_v12 = vld [vmem:[%s3815_s0 + $0x110] sm:$0xf] }
  0xc1   :  { %v548_v29 = vadd.f32 %v547_v15, %v535_v19  ;;  %v604_v15 = vld [vmem:[%s3815_s0 + $0xb4] sm:$0xff]  ;;  %630 = vst [vmem:[#allocation1 + $0x23] ss:$4 sm:$0xff] %v607_v12 }
  0xc2   :  { %620 = vst [vmem:[#allocation1 + $0x2] ss:$4 sm:$0xff] %v604_v15 }
  0xc3   :  { %v2910_v44 = vmax.f32 %v548_v29, 0.0  ;;  %667 = vmatpush.bf16.msra.mxu3 %v2590_v25  ;;  %v601_v29 = vld [vmem:[%s3815_s0 + $0x14] sm:$0xf] }
  0xc4   :  { %624 = vst [vmem:[#allocation1 + $0x20] ss:$4 sm:$0xff] %v601_v29 }
  0xc5   :  { %3900 = vst [vmem:[#allocation30_spill] sm:$0xff] %v2910_v44  ;;  %2225 = vmatmul.msk.f32.vlgmr.msrb.gmra.mxu2 %vm552_vm0, %v2910_v44 }
  0xc6   :  { %v536_v11 = vpop.f32.mrf.mxu0  ;;  %701 = vmatpush.bf16.msrb.mxu2 %v2655_v40 }
  0xc7   :  { %v549_v46 = vpop.f32.mrf.mxu1  ;;  %668 = vmatpush.bf16.msra.mxu3 %v2623_v32  ;;  %v603_v11 = vld [vmem:[%s3815_s0 + $0x68] sm:$0xf] }
  0xc8   :  { %v605_v46 = vld [vmem:[%s3815_s0 + $0xbc] sm:$0xf]  ;;  %626 = vst [vmem:[#allocation1 + $0x21] ss:$4 sm:$0xff] %v603_v11 }
  0xc9   :  { %v631_v23 = vld.sshfl [vmem:[#allocation1] sm:$0xff pattern:$0x73625140]  ;;  %628 = vst [vmem:[#allocation1 + $0x22] ss:$4 sm:$0xff] %v605_v46 }
  0xca   :  { %702 = vmatpush.bf16.msrb.mxu2 %v2681_v48  ;;  %v643_v19 = vpack.c.bf16 %v631_v23, %v631_v23  ;;  %v633_v18 = vld.sshfl [vmem:[#allocation1 + $0x10] sm:$0xff pattern:$0x73625140]  ;;  %v632_v12 = vld.sshfl [vmem:[#allocation1 + $0x8] sm:$0xff pattern:$0x73625140] }
  0xcb   :  { %669 = vmatpush.bf16.msra.mxu3 %v2642_v36  ;;  %v645_v43 = vpack.c.bf16 %v633_v18, %v633_v18  ;;  %v644_v18 = vpack.c.bf16 %v632_v12, %v632_v12  ;;  %v3906_v12 = vld [vmem:[#allocation14_spill] sm:$0xff] }
  0xcd   :  { %657 = vmatmul.bf16.vlgmr.msra.gmra.mxu2 %v643_v19  ;;  %v634_v19 = vld.sshfl [vmem:[#allocation1 + $0x18] sm:$0xff pattern:$0x73625140]  ;;  %683 = vmatmul.bf16.vlgmr.msra.gmra.mxu0 %v645_v43 }
  0xce   :  { %703 = vmatpush.bf16.msrb.mxu2 %v2695_v52  ;;  %v646_v11 = vpack.c.bf16 %v634_v19, %v634_v19  ;;  %876 = vmatpush.bf16.msra.mxu0 %v2655_v40  ;;  %v3902_v19 = vld [vmem:[#allocation8_spill] sm:$0xff] }
  0xd0   :  { %v635_v15 = vld.sshfl [vmem:[#allocation1 + $0x20] sm:$0xff pattern:$0x73625140]  ;;  %696 = vmatmul.bf16.vlgmr.msra.gmra.mxu1 %v646_v11  ;;  %v3904_v11 = vld [vmem:[#allocation10_spill] sm:$0xff] }
  0xd1   :  { %v647_v23 = vpack.c.bf16 %v635_v15, %v635_v15  ;;  %889 = vmatpush.bf16.msra.mxu1 %v2660_v41  ;;  %v636_v15 = vld.sshfl [vmem:[#allocation1 + $0x28] sm:$0xff pattern:$0x73625140] }
  0xd2   :  { %704 = vmatpush.bf16.msrb.mxu2 %v2707_v54  ;;  %877 = vmatpush.bf16.msra.mxu0 %v2681_v48  ;;  %v648_v43 = vpack.c.bf16 %v636_v15, %v636_v15 }
  0xd5   :  { %890 = vmatpush.bf16.msra.mxu1 %v2686_v49 }
  0xd6   :  { %705 = vmatpush.bf16.msrb.mxu2 %v2719_v56  ;;  %878 = vmatpush.bf16.msra.mxu0 %v2695_v52 }
  0xd9   :  { %891 = vmatpush.bf16.msra.mxu1 %v2700_v53 }
  0xda   :  { %706 = vmatpush.bf16.msrb.mxu2 %v2731_v58  ;;  %879 = vmatpush.bf16.msra.mxu0 %v2707_v54 }
  0xdd   :  { %892 = vmatpush.bf16.msra.mxu1 %v2712_v55 }
  0xde   :  { %707 = vmatpush.bf16.msrb.mxu2 %v2743_v60  ;;  %880 = vmatpush.bf16.msra.mxu0 %v2719_v56 }
  0xe1   :  { %893 = vmatpush.bf16.msra.mxu1 %v2724_v57 }
  0xe2   :  { %708 = vmatpush.bf16.msrb.mxu2 %v2753_v62  ;;  %881 = vmatpush.bf16.msra.mxu0 %v2731_v58 }
  0xe5   :  { %709 = vmatmul.bf16.vlgmr.msrb.gmra.mxu2 %v647_v23  ;;  %894 = vmatpush.bf16.msra.mxu1 %v2736_v59  ;;  %v3901_v23 = vld [vmem:[#allocation6_spill] sm:$0xff] }
  0xe6   :  { %739 = vmatpush.msra.mxu2 %v2799_v26  ;;  %882 = vmatpush.bf16.msra.mxu0 %v2743_v60 }
  0xe8   :  { %740 = vmatpush.msra.mxu2 %v2804_v27 }
  0xe9   :  { %895 = vmatpush.bf16.msra.mxu1 %v2748_v61 }
  0xea   :  { %741 = vmatpush.msra.mxu2 %v2810_v30  ;;  %883 = vmatpush.bf16.msra.mxu0 %v2753_v62 }
  0xec   :  { %742 = vmatpush.msra.mxu2 %v2817_v33 }
  0xed   :  { %896 = vmatpush.bf16.msra.mxu1 %v2758_v63 }
  0xee   :  { %743 = vmatpush.msra.mxu2 %v2822_v38 }
  0xf0   :  { %744 = vmatpush.msra.mxu2 %v2829_v39 }
  0xf2   :  { %745 = vmatpush.msra.mxu2 %v2835_v45 }
  0xf4   :  { %746 = vmatpush.msra.mxu2 %v2841_v47 }
  0xf6   :  { %850 = vmatpush.bf16.msrb.mxu2 %v2477_v4 }
  0xfa   :  { %851 = vmatpush.bf16.msrb.mxu2 %v2488_v6 }
  0xfe   :  { %852 = vmatpush.bf16.msrb.mxu2 %v2512_v10 }
 0x102   :  { %853 = vmatpush.bf16.msrb.mxu2 %v2545_v17 }
 0x106   :  { %854 = vmatpush.bf16.msrb.mxu2 %v2572_v22 }
 0x10a   :  { %855 = vmatpush.bf16.msrb.mxu2 %v2602_v28 }
 0x10e   :  { %856 = vmatpush.bf16.msrb.mxu2 %v2632_v34 }
 0x112   :  { %857 = vmatpush.bf16.msrb.mxu2 %v2666_v42 }
 0x148   :  { %v573_v29 = vpop.f32.mrf.mxu2 }
 0x149   :  { %2315 = vtanh.f32 %v573_v29  ;;  %v3903_v29 = vld [vmem:[#allocation9_spill] sm:$0xff] }
 0x14d   :  { %v697_v44 = vpop.f32.mrf.mxu1 }
 0x14f   :  { %v2316_v46 = vpop.eup %2315 }
 0x150   :  { %2226 = vmatmul.msk.f32.vlgmr.msrb.gmra.mxu3 %vm552_vm0, %v2316_v46  ;;  %v3905_v46 = vld [vmem:[#allocation11_spill] sm:$0xff] }
 0x151   :  { %714 = vmatpush.bf16.msrb.mxu3 %v2660_v41 }
 0x155   :  { %715 = vmatpush.bf16.msrb.mxu3 %v2686_v49  ;;  %v3908_v49 = vld [vmem:[#allocation29_spill] sm:$0xff] }
 0x158   :  { %670 = vmatmul.bf16.vlgmr.msra.gmra.mxu3 %v644_v18  ;;  %v658_v18 = vpop.f32.mrf.mxu2 }
 0x159   :  { %716 = vmatpush.bf16.msrb.mxu3 %v2700_v53  ;;  %v659_v41 = vadd.f32 %v3908_v49, %v658_v18  ;;  %v3910_v18 = vld [vmem:[#allocation3_spill] sm:$0xff] }
 0x15d   :  { %717 = vmatpush.bf16.msrb.mxu3 %v2712_v55 }
 0x160   :  { %v660_v15 = vpop.f32.mrf.mxu2 }
 0x161   :  { %718 = vmatpush.bf16.msrb.mxu3 %v2724_v57  ;;  %v782_v15 = vld [vmem:[%s3815_s0 + $0x11c] sm:$0xf] }
 0x162   :  { %805 = vst [vmem:[#allocation1 + $0x23] ss:$4 sm:$0xff] %v782_v15 }
 0x165   :  { %719 = vmatpush.bf16.msrb.mxu3 %v2736_v59  ;;  %v699_v59 = vpop.f32.mrf.mxu1 }
 0x169   :  { %720 = vmatpush.bf16.msrb.mxu3 %v2748_v61 }
 0x16d   :  { %721 = vmatpush.bf16.msrb.mxu3 %v2758_v63  ;;  %v710_v63 = vpop.f32.mrf.mxu2 }
 0x170   :  { %722 = vmatmul.bf16.vlgmr.msrb.gmra.mxu3 %v648_v43  ;;  %v684_v43 = vpop.f32.mrf.mxu0 }
 0x171   :  { %763 = vmatpush.msra.mxu3 %v2848_v50 }
 0x173   :  { %764 = vmatpush.msra.mxu3 %v2853_v51 }
 0x175   :  { %765 = vmatpush.msra.mxu3 %v2859_v14  ;;  %v712_v55 = vpop.f32.mrf.mxu2 }
 0x177   :  { %766 = vmatpush.msra.mxu3 %v2866_v0 }
 0x178   :  { %v686_v61 = vpop.f32.mrf.mxu0 }
 0x179   :  { %767 = vmatpush.msra.mxu3 %v2872_v37 }
 0x17b   :  { %768 = vmatpush.msra.mxu3 %v2884_v16 }
 0x17d   :  { %769 = vmatpush.msra.mxu3 %v2890_v2 }
 0x17f   :  { %770 = vmatpush.msra.mxu3 %v2898_v8 }
 0x181   :  { %863 = vmatpush.bf16.msrb.mxu3 %v2482_v5 }
 0x185   :  { %864 = vmatpush.bf16.msrb.mxu3 %v2494_v7 }
 0x189   :  { %865 = vmatpush.bf16.msrb.mxu3 %v3901_v23 }
 0x18d   :  { %866 = vmatpush.bf16.msrb.mxu3 %v3902_v19 }
 0x191   :  { %867 = vmatpush.bf16.msrb.mxu3 %v3903_v29 }
 0x195   :  { %868 = vmatpush.bf16.msrb.mxu3 %v3904_v11 }
 0x199   :  { %869 = vmatpush.bf16.msrb.mxu3 %v3905_v46 }
 0x19d   :  { %870 = vmatpush.bf16.msrb.mxu3 %v3906_v12 }
 0x1d3   :  { %v3007_v57 = vpop.f32.mrf.mxu3 }
 0x1d4   :  { %3907 = vst [vmem:[#allocation6_spill] sm:$0xff] %v3007_v57 }
 0x1db   :  { %v671_v53 = vpop.f32.mrf.mxu3 }
 0x1dc   :  { %v672_v60 = vadd.f32 %v671_v53, %v659_v41  ;;  %v775_v41 = vld [vmem:[%s3815_s0 + $0x18] sm:$0xff] }
 0x1dd   :  { %v781_v53 = vld [vmem:[%s3815_s0 + $0x114] sm:$0xff]  ;;  %791 = vst [vmem:[#allocation1] ss:$4 sm:$0xff] %v775_v41 }
 0x1de   :  { %v685_v58 = vadd.f32 %v684_v43, %v672_v60  ;;  %797 = vst [vmem:[#allocation1 + $0x3] ss:$4 sm:$0xff] %v781_v53  ;;  %v3911_v43 = vld [vmem:[#allocation4_spill] sm:$0xff]  ;;  %v3913_v53 = vld [vmem:[#allocation7_spill] sm:$0xff] }
 0x1e0   :  { %v698_v56 = vadd.f32 %v697_v44, %v685_v58  ;;  %v780_v44 = vld [vmem:[%s3815_s0 + $0xc8] sm:$0xf] }
 0x1e1   :  { %803 = vst [vmem:[#allocation1 + $0x22] ss:$4 sm:$0xff] %v780_v44 }
 0x1e2   :  { %v711_v54 = vadd.f32 %v710_v63, %v698_v56  ;;  %v778_v63 = vld [vmem:[%s3815_s0 + $0x74] sm:$0xf] }
 0x1e3   :  { %v673_v62 = vpop.f32.mrf.mxu3  ;;  %801 = vst [vmem:[#allocation1 + $0x21] ss:$4 sm:$0xff] %v778_v63 }
 0x1e4   :  { %v776_v62 = vld [vmem:[%s3815_s0 + $0x20] sm:$0xf] }
 0x1e5   :  { %799 = vst [vmem:[#allocation1 + $0x20] ss:$4 sm:$0xff] %v776_v62 }
 0x1ec   :  { %v811_v41 = vld.sshfl [vmem:[#allocation1 + $0x28] sm:$0xff pattern:$0x73625140] }
 0x1f3   :  { %v723_v52 = vpop.f32.mrf.mxu3 }
 0x1f4   :  { %v724_v48 = vadd.f32 %v723_v52, %v711_v54  ;;  %v779_v52 = vld [vmem:[%s3815_s0 + $0xc0] sm:$0xff] }
 0x1f5   :  { %795 = vst [vmem:[#allocation1 + $0x2] ss:$4 sm:$0xff] %v779_v52  ;;  %v823_v52 = vpack.c.bf16 %v811_v41, %v811_v41 }
 0x1f6   :  { %v3010_v40 = vmax.f32 %v724_v48, 0.0  ;;  %v777_v48 = vld [vmem:[%s3815_s0 + $0x6c] sm:$0xff] }
 0x1f7   :  { %793 = vst [vmem:[#allocation1 + $0x1] ss:$4 sm:$0xff] %v777_v48 }
 0x1f8   :  { %3909 = vst [vmem:[#allocation8_spill] sm:$0xff] %v3010_v40  ;;  %2227 = vmatmul.msk.f32.vlgmr.msra.gmra.mxu2 %vm552_vm0, %v3010_v40 }
 0x1f9   :  { %914 = vmatpush.msra.mxu2 %v2799_v26 }
 0x1fb   :  { %v725_v59 = vpop.f32.mrf.mxu3  ;;  %915 = vmatpush.msra.mxu2 %v2804_v27 }
 0x1fc   :  { %v3912_v59 = vld [vmem:[#allocation5_spill] sm:$0xff] }
 0x1fd   :  { %916 = vmatpush.msra.mxu2 %v2810_v30 }
 0x1fe   :  { %v806_v54 = vld.sshfl [vmem:[#allocation1] sm:$0xff pattern:$0x73625140]  ;;  %v807_v55 = vld.sshfl [vmem:[#allocation1 + $0x8] sm:$0xff pattern:$0x73625140] }
 0x1ff   :  { %917 = vmatpush.msra.mxu2 %v2817_v33  ;;  %v818_v56 = vpack.c.bf16 %v806_v54, %v806_v54  ;;  %v819_v58 = vpack.c.bf16 %v807_v55, %v807_v55  ;;  %v808_v60 = vld.sshfl [vmem:[#allocation1 + $0x10] sm:$0xff pattern:$0x73625140] }
 0x200   :  { %v820_v61 = vpack.c.bf16 %v808_v60, %v808_v60 }
 0x201   :  { %918 = vmatpush.msra.mxu2 %v2822_v38  ;;  %832 = vmatmul.bf16.vlgmr.msrb.gmra.mxu0 %v818_v56 }
 0x202   :  { %845 = vmatmul.bf16.vlgmr.msrb.gmra.mxu1 %v819_v58  ;;  %858 = vmatmul.bf16.vlgmr.msrb.gmra.mxu2 %v820_v61 }
 0x203   :  { %919 = vmatpush.msra.mxu2 %v2829_v39  ;;  %1025 = vmatpush.bf16.msrb.mxu0 %v2477_v4 }
 0x204   :  { %1038 = vmatpush.bf16.msrb.mxu1 %v2482_v5  ;;  %v810_v5 = vld.sshfl [vmem:[#allocation1 + $0x20] sm:$0xff pattern:$0x73625140] }
 0x205   :  { %920 = vmatpush.msra.mxu2 %v2835_v45  ;;  %v822_v48 = vpack.c.bf16 %v810_v5, %v810_v5 }
 0x207   :  { %921 = vmatpush.msra.mxu2 %v2841_v47  ;;  %1026 = vmatpush.bf16.msrb.mxu0 %v2488_v6 }
 0x208   :  { %1039 = vmatpush.bf16.msrb.mxu1 %v2494_v7 }
 0x209   :  { %999 = vmatpush.bf16.msrb.mxu2 %v3910_v18 }
 0x20b   :  { %1027 = vmatpush.bf16.msrb.mxu0 %v2512_v10 }
 0x20c   :  { %1040 = vmatpush.bf16.msrb.mxu1 %v3901_v23 }
 0x20d   :  { %1000 = vmatpush.bf16.msrb.mxu2 %v3911_v43 }
 0x20f   :  { %1028 = vmatpush.bf16.msrb.mxu0 %v2545_v17 }
 0x210   :  { %1041 = vmatpush.bf16.msrb.mxu1 %v3902_v19  ;;  %v809_v19 = vld.sshfl [vmem:[#allocation1 + $0x18] sm:$0xff pattern:$0x73625140] }
 0x211   :  { %1001 = vmatpush.bf16.msrb.mxu2 %v3912_v59  ;;  %884 = vmatmul.bf16.vlgmr.msra.gmra.mxu0 %v822_v48  ;;  %v3915_v48 = vld [vmem:[#allocation12_spill] sm:$0xff] }
 0x212   :  { %897 = vmatmul.bf16.vlgmr.msra.gmra.mxu1 %v823_v52  ;;  %v3916_v52 = vld [vmem:[#allocation15_spill] sm:$0xff] }
 0x213   :  { %1029 = vmatpush.bf16.msrb.mxu0 %v2572_v22 }
 0x214   :  { %1042 = vmatpush.bf16.msrb.mxu1 %v3903_v29  ;;  %v821_v29 = vpack.c.bf16 %v809_v19, %v809_v19  ;;  %v3920_v19 = vld [vmem:[#allocation23_spill] sm:$0xff] }
 0x215   :  { %1002 = vmatpush.bf16.msrb.mxu2 %v3913_v53  ;;  %v3917_v53 = vld [vmem:[#allocation17_spill] sm:$0xff] }
 0x217   :  { %1030 = vmatpush.bf16.msrb.mxu0 %v2602_v28 }
 0x218   :  { %1043 = vmatpush.bf16.msrb.mxu1 %v3904_v11 }
 0x219   :  { %1003 = vmatpush.bf16.msrb.mxu2 %v2561_v20 }
 0x21b   :  { %1031 = vmatpush.bf16.msrb.mxu0 %v2632_v34 }
 0x21c   :  { %1044 = vmatpush.bf16.msrb.mxu1 %v3905_v46 }
 0x21d   :  { %1004 = vmatpush.bf16.msrb.mxu2 %v2585_v24 }
 0x21f   :  { %1032 = vmatpush.bf16.msrb.mxu0 %v2666_v42 }
 0x220   :  { %1045 = vmatpush.bf16.msrb.mxu1 %v3906_v12 }
 0x221   :  { %1005 = vmatpush.bf16.msrb.mxu2 %v2618_v31 }
 0x223   :  { %1089 = vmatpush.msra.mxu0 %v2799_v26 }
 0x224   :  { %1113 = vmatpush.msra.mxu1 %v2848_v50 }
 0x225   :  { %1006 = vmatpush.bf16.msrb.mxu2 %v2637_v35  ;;  %1090 = vmatpush.msra.mxu0 %v2804_v27 }
 0x226   :  { %1114 = vmatpush.msra.mxu1 %v2853_v51 }
 0x227   :  { %1091 = vmatpush.msra.mxu0 %v2810_v30 }
 0x228   :  { %1115 = vmatpush.msra.mxu1 %v2859_v14 }
 0x229   :  { %1092 = vmatpush.msra.mxu0 %v2817_v33 }
 0x22a   :  { %1116 = vmatpush.msra.mxu1 %v2866_v0 }
 0x22b   :  { %1093 = vmatpush.msra.mxu0 %v2822_v38 }
 0x22c   :  { %1117 = vmatpush.msra.mxu1 %v2872_v37 }
 0x22d   :  { %1094 = vmatpush.msra.mxu0 %v2829_v39 }
 0x22e   :  { %1118 = vmatpush.msra.mxu1 %v2884_v16 }
 0x22f   :  { %1095 = vmatpush.msra.mxu0 %v2835_v45 }
 0x230   :  { %1119 = vmatpush.msra.mxu1 %v2890_v2 }
 0x231   :  { %1096 = vmatpush.msra.mxu0 %v2841_v47 }
 0x232   :  { %1120 = vmatpush.msra.mxu1 %v2898_v8 }
 0x27b   :  { %v748_v7 = vpop.f32.mrf.mxu2 }
 0x27c   :  { %2317 = vtanh.f32 %v748_v7  ;;  %v3918_v7 = vld [vmem:[#allocation19_spill] sm:$0xff] }
 0x27e   :  { %v833_v11 = vpop.f32.mrf.mxu0 }
 0x27f   :  { %v846_v54 = vpop.f32.mrf.mxu1 }
 0x282   :  { %v2318_v23 = vpop.eup %2317 }
 0x283   :  { %2228 = vmatmul.msk.f32.vlgmr.msra.gmra.mxu3 %vm552_vm0, %v2318_v23  ;;  %v3919_v23 = vld [vmem:[#allocation21_spill] sm:$0xff] }
 0x284   :  { %938 = vmatpush.msra.mxu3 %v2848_v50 }
 0x285   :  { %v859_v55 = vpop.f32.mrf.mxu2 }
 0x286   :  { %939 = vmatpush.msra.mxu3 %v2853_v51  ;;  %v835_v56 = vpop.f32.mrf.mxu0 }
 0x287   :  { %v848_v58 = vpop.f32.mrf.mxu1  ;;  %v954_v56 = vld [vmem:[%s3815_s0 + $0xcc] sm:$0xff] }
 0x288   :  { %940 = vmatpush.msra.mxu3 %v2859_v14  ;;  %v956_v58 = vld [vmem:[%s3815_s0 + $0x120] sm:$0xff]  ;;  %970 = vst [vmem:[#allocation1 + $0x2] ss:$4 sm:$0xff] %v954_v56  ;;  %v3924_v56 = vld [vmem:[#allocation16_spill] sm:$0xff] }
 0x289   :  { %972 = vst [vmem:[#allocation1 + $0x3] ss:$4 sm:$0xff] %v956_v58  ;;  %v3191_v58 = vld [vmem:[%s3816_s1 + $0x20] sm:$0xff] }
 0x28a   :  { %941 = vmatpush.msra.mxu3 %v2866_v0 }
 0x28b   :  { %871 = vmatmul.bf16.vlgmr.msrb.gmra.mxu3 %v821_v29  ;;  %v3921_v29 = vld [vmem:[#allocation25_spill] sm:$0xff] }
 0x28c   :  { %942 = vmatpush.msra.mxu3 %v2872_v37 }
 0x28e   :  { %943 = vmatpush.msra.mxu3 %v2884_v16  ;;  %v885_v60 = vpop.f32.mrf.mxu0 }
 0x290   :  { %944 = vmatpush.msra.mxu3 %v2890_v2 }
 0x292   :  { %945 = vmatpush.msra.mxu3 %v2898_v8 }
 0x294   :  { %1012 = vmatpush.bf16.msrb.mxu3 %v2460_v1  ;;  %v861_v1 = vpop.f32.mrf.mxu2 }
 0x296   :  { %v887_v61 = vpop.f32.mrf.mxu0 }
 0x297   :  { %v953_v61 = vld [vmem:[%s3815_s0 + $0x80] sm:$0xf] }
 0x298   :  { %1013 = vmatpush.bf16.msrb.mxu3 %v2472_v3  ;;  %v898_v3 = vpop.f32.mrf.mxu1  ;;  %976 = vst [vmem:[#allocation1 + $0x21] ss:$4 sm:$0xff] %v953_v61  ;;  %v3250_v61 = vld [vmem:[%s3816_s1 + $0xd8] sm:$0xff] }
 0x29c   :  { %1014 = vmatpush.bf16.msrb.mxu3 %v2506_v9 }
 0x2a0   :  { %1015 = vmatpush.bf16.msrb.mxu3 %v2530_v13  ;;  %v900_v9 = vpop.f32.mrf.mxu1  ;;  %v834_v13 = vadd.f32 %v3908_v49, %v833_v11  ;;  %v3922_v11 = vld [vmem:[#allocation27_spill] sm:$0xff] }
 0x2a1   :  { %v955_v9 = vld [vmem:[%s3815_s0 + $0xd4] sm:$0xf] }
 0x2a2   :  { %v847_v63 = vadd.f32 %v846_v54, %v834_v13  ;;  %v950_v54 = vld [vmem:[%s3815_s0 + $0x24] sm:$0xff]  ;;  %978 = vst [vmem:[#allocation1 + $0x22] ss:$4 sm:$0xff] %v955_v9  ;;  %v3256_v9 = vld [vmem:[%s3816_s1 + $0xd0] sm:$0xff] }
 0x2a3   :  { %966 = vst [vmem:[#allocation1] ss:$4 sm:$0xff] %v950_v54  ;;  %v957_v13 = vld [vmem:[%s3815_s0 + $0x128] sm:$0xf] }
 0x2a4   :  { %1016 = vmatpush.bf16.msrb.mxu3 %v2566_v21  ;;  %v860_v44 = vadd.f32 %v859_v55, %v847_v63  ;;  %v952_v55 = vld [vmem:[%s3815_s0 + $0x78] sm:$0xff]  ;;  %980 = vst [vmem:[#allocation1 + $0x23] ss:$4 sm:$0xff] %v957_v13  ;;  %v3177_v54 = vld [vmem:[%s3816_s1 + $0x28] sm:$0xff] }
 0x2a5   :  { %968 = vst [vmem:[#allocation1 + $0x1] ss:$4 sm:$0xff] %v952_v55 }
 0x2a8   :  { %1017 = vmatpush.bf16.msrb.mxu3 %v2590_v25 }
 0x2ac   :  { %1018 = vmatpush.bf16.msrb.mxu3 %v2623_v32  ;;  %v981_v1 = vld.sshfl [vmem:[#allocation1] sm:$0xff pattern:$0x73625140] }
 0x2b0   :  { %1019 = vmatpush.bf16.msrb.mxu3 %v2642_v36 }
 0x306   :  { %v3104_v62 = vpop.f32.mrf.mxu3 }
 0x30e   :  { %v872_v18 = vpop.f32.mrf.mxu3 }
 0x30f   :  { %v873_v15 = vadd.f32 %v872_v18, %v860_v44 }
 0x311   :  { %v886_v43 = vadd.f32 %v885_v60, %v873_v15  ;;  %v993_v60 = vpack.c.bf16 %v981_v1, %v981_v1  ;;  %v984_v15 = vld.sshfl [vmem:[#allocation1 + $0x18] sm:$0xff pattern:$0x73625140] }
 0x312   :  { %v3925_v1 = vld [vmem:[#allocation18_spill] sm:$0xff] }
 0x313   :  { %v899_v59 = vadd.f32 %v898_v3, %v886_v43  ;;  %v951_v3 = vld [vmem:[%s3815_s0 + $0x2c] sm:$0xf] }
 0x314   :  { %974 = vst [vmem:[#allocation1 + $0x20] ss:$4 sm:$0xff] %v951_v3  ;;  %v3930_v3 = vld [vmem:[#allocation28_spill] sm:$0xff] }
 0x315   :  { %v3106_v5 = vmax.f32 %v899_v59, 0.0  ;;  %v996_v59 = vpack.c.bf16 %v984_v15, %v984_v15 }
 0x316   :  { %v874_v41 = vpop.f32.mrf.mxu3 }
 0x317   :  { %3914 = vst [vmem:[#allocation9_spill] sm:$0xff] %v3106_v5  ;;  %2229 = vmatmul.msk.f32.vlgmr.msra.gmra.mxu2 %vm552_vm0, %v3106_v5  ;;  %v3149_v41 = vld [vmem:[%s3816_s1 + $0x38] sm:$0xff]  ;;  %1046 = vmatmul.bf16.vlgmr.msrb.gmra.mxu1 %v996_v59 }
 0x318   :  { %1051 = vmatpush.bf16.msra.mxu2 %v3915_v48  ;;  %v3923_v48 = vld [vmem:[#allocation13_spill] sm:$0xff] }
 0x31b   :  { %v985_v63 = vld.sshfl [vmem:[#allocation1 + $0x20] sm:$0xff pattern:$0x73625140] }
 0x31c   :  { %1052 = vmatpush.bf16.msra.mxu2 %v3916_v52  ;;  %v997_v18 = vpack.c.bf16 %v985_v63, %v985_v63  ;;  %v982_v52 = vld.sshfl [vmem:[#allocation1 + $0x8] sm:$0xff pattern:$0x73625140] }
 0x31d   :  { %v994_v55 = vpack.c.bf16 %v982_v52, %v982_v52 }
 0x31f   :  { %1007 = vmatmul.bf16.vlgmr.msrb.gmra.mxu2 %v993_v60  ;;  %v3927_v60 = vld [vmem:[#allocation22_spill] sm:$0xff] }
 0x320   :  { %1053 = vmatpush.bf16.msra.mxu2 %v3917_v53 }
 0x324   :  { %1054 = vmatpush.bf16.msra.mxu2 %v3918_v7 }
 0x328   :  { %1055 = vmatpush.bf16.msra.mxu2 %v3919_v23 }
 0x32c   :  { %1056 = vmatpush.bf16.msra.mxu2 %v3920_v19 }
 0x330   :  { %1057 = vmatpush.bf16.msra.mxu2 %v3921_v29 }
 0x334   :  { %1058 = vmatpush.bf16.msra.mxu2 %v3922_v11 }
 0x337   :  { %1059 = vmatmul.bf16.vlgmr.msra.gmra.mxu2 %v997_v18 }
 0x338   :  { %1200 = vmatpush.bf16.msrb.mxu2 %v2477_v4  ;;  %v983_v4 = vld.sshfl [vmem:[#allocation1 + $0x10] sm:$0xff pattern:$0x73625140] }
 0x339   :  { %v995_v44 = vpack.c.bf16 %v983_v4, %v983_v4 }
 0x33b   :  { %1033 = vmatmul.bf16.vlgmr.msrb.gmra.mxu0 %v995_v44 }
 0x33c   :  { %1201 = vmatpush.bf16.msrb.mxu2 %v2488_v6  ;;  %1174 = vmatpush.bf16.msrb.mxu0 %v3149_v41  ;;  %v3156_v6 = vld [vmem:[%s3816_s1 + $0x78] sm:$0xff] }
 0x33d   :  { %1187 = vmatpush.bf16.msrb.mxu1 %v3156_v6 }
 0x340   :  { %1202 = vmatpush.bf16.msrb.mxu2 %v2512_v10  ;;  %v3162_v10 = vld [vmem:[%s3816_s1 + $0x30] sm:$0xff] }
 0x341   :  { %1175 = vmatpush.bf16.msrb.mxu0 %v3162_v10 }
 0x344   :  { %1203 = vmatpush.bf16.msrb.mxu2 %v2545_v17 }
 0x345   :  { %1176 = vmatpush.bf16.msrb.mxu0 %v3177_v54 }
 0x348   :  { %1204 = vmatpush.bf16.msrb.mxu2 %v2572_v22  ;;  %v3169_v22 = vld [vmem:[%s3816_s1 + $0x70] sm:$0xff] }
 0x349   :  { %1188 = vmatpush.bf16.msrb.mxu1 %v3169_v22  ;;  %1177 = vmatpush.bf16.msrb.mxu0 %v3191_v58 }
 0x34c   :  { %1205 = vmatpush.bf16.msrb.mxu2 %v2602_v28  ;;  %v3184_v28 = vld [vmem:[%s3816_s1 + $0x68] sm:$0xff] }
 0x34d   :  { %1189 = vmatpush.bf16.msrb.mxu1 %v3184_v28  ;;  %1178 = vmatpush.bf16.msrb.mxu0 %v2561_v20  ;;  %v3928_v20 = vld [vmem:[#allocation24_spill] sm:$0xff] }
 0x350   :  { %1206 = vmatpush.bf16.msrb.mxu2 %v2632_v34  ;;  %v3198_v34 = vld [vmem:[%s3816_s1 + $0x60] sm:$0xff] }
 0x351   :  { %1190 = vmatpush.bf16.msrb.mxu1 %v3198_v34  ;;  %1179 = vmatpush.bf16.msrb.mxu0 %v2585_v24  ;;  %v986_v24 = vld.sshfl [vmem:[#allocation1 + $0x28] sm:$0xff pattern:$0x73625140] }
 0x354   :  { %1207 = vmatpush.bf16.msrb.mxu2 %v2666_v42  ;;  %v3926_v42 = vld [vmem:[#allocation20_spill] sm:$0xff] }
 0x355   :  { %1191 = vmatpush.bf16.msrb.mxu1 %v2566_v21  ;;  %1180 = vmatpush.bf16.msrb.mxu0 %v2618_v31  ;;  %v3929_v21 = vld [vmem:[#allocation26_spill] sm:$0xff] }
 0x356   :  { %v3226_v31 = vld [vmem:[%s3816_s1 + $0xf8] sm:$0xff] }
 0x358   :  { %1264 = vmatpush.msra.mxu2 %v2799_v26 }
 0x359   :  { %1192 = vmatpush.bf16.msrb.mxu1 %v2590_v25  ;;  %1181 = vmatpush.bf16.msrb.mxu0 %v2637_v35  ;;  %v998_v25 = vpack.c.bf16 %v986_v24, %v986_v24  ;;  %v3238_v35 = vld [vmem:[%s3816_s1 + $0xe8] sm:$0xff]  ;;  %v3309_v24 = vld [vmem:[%s3816_s1 + $0xb8] sm:$0xff] }
 0x35a   :  { %1265 = vmatpush.msra.mxu2 %v2804_v27 }
 0x35c   :  { %1266 = vmatpush.msra.mxu2 %v2810_v30 }
 0x35d   :  { %1193 = vmatpush.bf16.msrb.mxu1 %v2623_v32  ;;  %v3232_v32 = vld [vmem:[%s3816_s1 + $0xf0] sm:$0xff] }
 0x35e   :  { %1267 = vmatpush.msra.mxu2 %v2817_v33 }
 0x360   :  { %1268 = vmatpush.msra.mxu2 %v2822_v38 }
 0x361   :  { %1194 = vmatpush.bf16.msrb.mxu1 %v2642_v36  ;;  %v3244_v36 = vld [vmem:[%s3816_s1 + $0xe0] sm:$0xff] }
 0x362   :  { %1269 = vmatpush.msra.mxu2 %v2829_v39 }
 0x364   :  { %1270 = vmatpush.msra.mxu2 %v2835_v45 }
 0x366   :  { %1271 = vmatpush.msra.mxu2 %v2841_v47 }
 0x39a   :  { %v923_v43 = vpop.f32.mrf.mxu2 }
 0x39b   :  { %2319 = vtanh.f32 %v923_v43 }
 0x3a1   :  { %v2320_v17 = vpop.eup %2319 }
 0x3a2   :  { %2230 = vmatmul.msk.f32.vlgmr.msra.gmra.mxu3 %vm552_vm0, %v2320_v17  ;;  %v1008_v13 = vpop.f32.mrf.mxu2 }
 0x3a3   :  { %1064 = vmatpush.bf16.msra.mxu3 %v3923_v48  ;;  %v1009_v15 = vadd.f32 %v3908_v49, %v1008_v13 }
 0x3a7   :  { %1065 = vmatpush.bf16.msra.mxu3 %v3924_v56 }
 0x3aa   :  { %1020 = vmatmul.bf16.vlgmr.msrb.gmra.mxu3 %v994_v55 }
 0x3ab   :  { %1066 = vmatpush.bf16.msra.mxu3 %v3925_v1 }
 0x3af   :  { %1067 = vmatpush.bf16.msra.mxu3 %v3926_v42  ;;  %v3279_v42 = vld [vmem:[%s3816_s1 + $0x138] sm:$0xff] }
 0x3b3   :  { %1068 = vmatpush.bf16.msra.mxu3 %v3927_v60  ;;  %v3285_v60 = vld [vmem:[%s3816_s1 + $0x130] sm:$0xff] }
 0x3b7   :  { %1069 = vmatpush.bf16.msra.mxu3 %v3928_v20  ;;  %v1125_v20 = vld [vmem:[%s3815_s0 + $0x30] sm:$0xff] }
 0x3b8   :  { %v1034_v4 = vpop.f32.mrf.mxu0  ;;  %1141 = vst [vmem:[#allocation1] ss:$4 sm:$0xff] %v1125_v20  ;;  %v3390_v20 = vld [vmem:[%s3816_s1 + $0x50] sm:$0xff] }
 0x3bb   :  { %1070 = vmatpush.bf16.msra.mxu3 %v3929_v21  ;;  %v1127_v21 = vld [vmem:[%s3815_s0 + $0x84] sm:$0xff] }
 0x3bc   :  { %1143 = vst [vmem:[#allocation1 + $0x1] ss:$4 sm:$0xff] %v1127_v21  ;;  %v3396_v21 = vld [vmem:[%s3816_s1 + $0x88] sm:$0xff] }
 0x3bf   :  { %1071 = vmatpush.bf16.msra.mxu3 %v3930_v3  ;;  %v1126_v3 = vld [vmem:[%s3815_s0 + $0x38] sm:$0xf] }
 0x3c0   :  { %1149 = vst [vmem:[#allocation1 + $0x20] ss:$4 sm:$0xff] %v1126_v3  ;;  %v3447_v3 = vld [vmem:[%s3816_s1 + $0x160] sm:$0xff] }
 0x3c2   :  { %1072 = vmatmul.bf16.vlgmr.msra.gmra.mxu3 %v998_v25 }
 0x3c3   :  { %1213 = vmatpush.bf16.msrb.mxu3 %v3226_v31 }
 0x3c7   :  { %1214 = vmatpush.bf16.msrb.mxu3 %v3232_v32 }
 0x3cb   :  { %1215 = vmatpush.bf16.msrb.mxu3 %v3238_v35 }
 0x3cf   :  { %1216 = vmatpush.bf16.msrb.mxu3 %v3244_v36 }
 0x3d3   :  { %1217 = vmatpush.bf16.msrb.mxu3 %v3250_v61 }
 0x3d7   :  { %1218 = vmatpush.bf16.msrb.mxu3 %v3256_v9 }
 0x3db   :  { %1219 = vmatpush.bf16.msrb.mxu3 %v3905_v46  ;;  %v1010_v46 = vpop.f32.mrf.mxu2 }
 0x3dc   :  { %v1128_v46 = vld [vmem:[%s3815_s0 + $0x8c] sm:$0xf] }
 0x3dd   :  { %1151 = vst [vmem:[#allocation1 + $0x21] ss:$4 sm:$0xff] %v1128_v46  ;;  %v3500_v46 = vld [vmem:[%s3819_s4 + $0x38] sm:$0xff] }
 0x3df   :  { %1220 = vmatpush.bf16.msrb.mxu3 %v3906_v12  ;;  %v1047_v12 = vpop.f32.mrf.mxu1 }
 0x3e3   :  { %1288 = vmatpush.msra.mxu3 %v2848_v50  ;;  %v1060_v63 = vpop.f32.mrf.mxu2  ;;  %v1036_v50 = vpop.f32.mrf.mxu0 }
 0x3e4   :  { %v3336_v50 = vld [vmem:[%s3816_s1 + $0xa8] sm:$0xff] }
 0x3e5   :  { %1289 = vmatpush.msra.mxu3 %v2853_v51 }
 0x3e7   :  { %1290 = vmatpush.msra.mxu3 %v2859_v14  ;;  %v1049_v44 = vpop.f32.mrf.mxu1 }
 0x3e8   :  { %v3344_v44 = vld [vmem:[%s3816_s1 + $0xa0] sm:$0xff] }
 0x3e9   :  { %1291 = vmatpush.msra.mxu3 %v2866_v0 }
 0x3eb   :  { %1292 = vmatpush.msra.mxu3 %v2872_v37  ;;  %v1062_v14 = vpop.f32.mrf.mxu2 }
 0x3ed   :  { %1293 = vmatpush.msra.mxu3 %v2884_v16 }
 0x3ef   :  { %1294 = vmatpush.msra.mxu3 %v2890_v2 }
 0x3f1   :  { %1295 = vmatpush.msra.mxu3 %v2898_v8 }
 0x425   :  { %v3269_v51 = vpop.f32.mrf.mxu3 }
 0x426   :  { %3931 = vst [vmem:[#allocation10_spill] sm:$0xff] %v3269_v51 }
 0x42d   :  { %v1021_v18 = vpop.f32.mrf.mxu3 }
 0x42e   :  { %v1022_v59 = vadd.f32 %v1021_v18, %v1009_v15 }
 0x430   :  { %v1035_v17 = vadd.f32 %v1034_v4, %v1022_v59  ;;  %v1130_v4 = vld [vmem:[%s3815_s0 + $0xe0] sm:$0xf]  ;;  %v3359_v59 = vld [vmem:[%s3816_s1 + $0x18] sm:$0xff] }
 0x431   :  { %1153 = vst [vmem:[#allocation1 + $0x22] ss:$4 sm:$0xff] %v1130_v4  ;;  %v3506_v4 = vld [vmem:[%s3819_s4 + $0x30] sm:$0xff] }
 0x432   :  { %v1048_v48 = vadd.f32 %v1047_v12, %v1035_v17  ;;  %v1132_v12 = vld [vmem:[%s3815_s0 + $0x134] sm:$0xf] }
 0x433   :  { %1155 = vst [vmem:[#allocation1 + $0x23] ss:$4 sm:$0xff] %v1132_v12  ;;  %v3512_v12 = vld [vmem:[%s3819_s4 + $0x28] sm:$0xff] }
 0x434   :  { %v1061_v52 = vadd.f32 %v1060_v63, %v1048_v48  ;;  %v3328_v63 = vld [vmem:[%s3816_s1 + $0xb0] sm:$0xff]  ;;  %v3365_v48 = vld [vmem:[%s3816_s1 + $0x58] sm:$0xff] }
 0x435   :  { %v1023_v43 = vpop.f32.mrf.mxu3 }
 0x436   :  { %v3353_v43 = vld [vmem:[%s3816_s1 + $0x98] sm:$0xff] }
 0x43a   :  { %v1160_v14 = vld.sshfl [vmem:[#allocation1 + $0x20] sm:$0xff pattern:$0x73625140] }
 0x43b   :  { %v1172_v15 = vpack.c.bf16 %v1160_v14, %v1160_v14 }
 0x445   :  { %v1073_v55 = vpop.f32.mrf.mxu3 }
 0x446   :  { %v1074_v56 = vadd.f32 %v1073_v55, %v1061_v52  ;;  %v3371_v52 = vld [vmem:[%s3816_s1 + $0x90] sm:$0xff]  ;;  %v3378_v55 = vld [vmem:[%s3816_s1 + $0x178] sm:$0xff] }
 0x448   :  { %v3272_v1 = vmax.f32 %v1074_v56, 0.0 }
 0x44a   :  { %3932 = vst [vmem:[#allocation11_spill] sm:$0xff] %v3272_v1  ;;  %2231 = vmatmul.msk.f32.vlgmr.msra.gmra.mxu0 %vm552_vm0, %v3272_v1 }
 0x44b   :  { %1226 = vmatpush.bf16.msra.mxu0 %v3279_v42 }
 0x44d   :  { %v1075_v49 = vpop.f32.mrf.mxu3 }
 0x44e   :  { %v3384_v49 = vld [vmem:[%s3816_s1 + $0x10] sm:$0xff] }
 0x44f   :  { %1227 = vmatpush.bf16.msra.mxu0 %v3285_v60 }
 0x453   :  { %1228 = vmatpush.bf16.msra.mxu0 %v3917_v53  ;;  %v1129_v53 = vld [vmem:[%s3815_s0 + $0xd8] sm:$0xff] }
 0x454   :  { %1145 = vst [vmem:[#allocation1 + $0x2] ss:$4 sm:$0xff] %v1129_v53 }
 0x457   :  { %1229 = vmatpush.bf16.msra.mxu0 %v3918_v7  ;;  %v1131_v7 = vld [vmem:[%s3815_s0 + $0x12c] sm:$0xff] }
 0x458   :  { %1147 = vst [vmem:[#allocation1 + $0x3] ss:$4 sm:$0xff] %v1131_v7  ;;  %v3402_v7 = vld [vmem:[%s3816_s1 + $0x170] sm:$0xff] }
 0x45b   :  { %1230 = vmatpush.bf16.msra.mxu0 %v3919_v23 }
 0x45f   :  { %1231 = vmatpush.bf16.msra.mxu0 %v3920_v19  ;;  %v1156_v23 = vld.sshfl [vmem:[#allocation1] sm:$0xff pattern:$0x73625140]  ;;  %v1159_v25 = vld.sshfl [vmem:[#allocation1 + $0x18] sm:$0xff pattern:$0x73625140] }
 0x460   :  { %v1168_v19 = vpack.c.bf16 %v1156_v23, %v1156_v23  ;;  %v1171_v13 = vpack.c.bf16 %v1159_v25, %v1159_v25  ;;  %v1157_v56 = vld.sshfl [vmem:[#allocation1 + $0x8] sm:$0xff pattern:$0x73625140]  ;;  %v3433_v25 = vld [vmem:[%s3816_s1] sm:$0xff] }
 0x461   :  { %v1169_v53 = vpack.c.bf16 %v1157_v56, %v1157_v56  ;;  %v3408_v23 = vld [vmem:[%s3816_s1 + $0x8] sm:$0xff] }
 0x462   :  { %1182 = vmatmul.bf16.vlgmr.msrb.gmra.mxu0 %v1168_v19  ;;  %1221 = vmatmul.bf16.vlgmr.msrb.gmra.mxu3 %v1171_v13  ;;  %v3414_v19 = vld [vmem:[%s3816_s1 + $0x48] sm:$0xff]  ;;  %v3494_v13 = vld [vmem:[%s3816_s1 + $0xc0] sm:$0xff] }
 0x463   :  { %1232 = vmatpush.bf16.msra.mxu0 %v3921_v29  ;;  %v1158_v29 = vld.sshfl [vmem:[#allocation1 + $0x10] sm:$0xff pattern:$0x73625140]  ;;  %1362 = vmatpush.bf16.msrb.mxu3 %v3156_v6 }
 0x467   :  { %1233 = vmatpush.bf16.msra.mxu0 %v3922_v11  ;;  %v1170_v11 = vpack.c.bf16 %v1158_v29, %v1158_v29  ;;  %1363 = vmatpush.bf16.msrb.mxu3 %v3169_v22  ;;  %v3420_v29 = vld [vmem:[%s3816_s1 + $0x80] sm:$0xff] }
 0x469   :  { %1208 = vmatmul.bf16.vlgmr.msrb.gmra.mxu2 %v1170_v11  ;;  %v3427_v11 = vld [vmem:[%s3816_s1 + $0x168] sm:$0xff] }
 0x46a   :  { %1349 = vmatpush.bf16.msrb.mxu2 %v3149_v41 }
 0x46b   :  { %1375 = vmatpush.bf16.msrb.mxu0 %v3309_v24  ;;  %1364 = vmatpush.bf16.msrb.mxu3 %v3184_v28 }
 0x46e   :  { %1350 = vmatpush.bf16.msrb.mxu2 %v3162_v10 }
 0x46f   :  { %1376 = vmatpush.bf16.msrb.mxu0 %v3328_v63  ;;  %1365 = vmatpush.bf16.msrb.mxu3 %v3198_v34 }
 0x472   :  { %1351 = vmatpush.bf16.msrb.mxu2 %v3177_v54  ;;  %1234 = vmatmul.bf16.vlgmr.msra.gmra.mxu0 %v1172_v15 }
 0x473   :  { %1377 = vmatpush.bf16.msrb.mxu0 %v3336_v50  ;;  %1366 = vmatpush.bf16.msrb.mxu3 %v3365_v48 }
 0x476   :  { %1352 = vmatpush.bf16.msrb.mxu2 %v3191_v58 }
 0x477   :  { %1378 = vmatpush.bf16.msrb.mxu0 %v3344_v44  ;;  %1367 = vmatpush.bf16.msrb.mxu3 %v3390_v20 }
 0x47a   :  { %1353 = vmatpush.bf16.msrb.mxu2 %v3359_v59 }
 0x47b   :  { %1379 = vmatpush.bf16.msrb.mxu0 %v3353_v43  ;;  %1368 = vmatpush.bf16.msrb.mxu3 %v3414_v19 }
 0x47e   :  { %1354 = vmatpush.bf16.msrb.mxu2 %v3384_v49 }
 0x47f   :  { %1380 = vmatpush.bf16.msrb.mxu0 %v3371_v52 }
 0x482   :  { %1355 = vmatpush.bf16.msrb.mxu2 %v3408_v23 }
 0x483   :  { %1381 = vmatpush.bf16.msrb.mxu0 %v3396_v21 }
 0x486   :  { %1356 = vmatpush.bf16.msrb.mxu2 %v3433_v25 }
 0x487   :  { %1382 = vmatpush.bf16.msrb.mxu0 %v3420_v29 }
 0x48b   :  { %1439 = vmatpush.msra.mxu0 %v2799_v26  ;;  %v3440_v26 = vld [vmem:[%s3816_s1 + $0x40] sm:$0xff] }
 0x48c   :  { %1369 = vmatpush.bf16.msrb.mxu3 %v3440_v26 }
 0x48d   :  { %1440 = vmatpush.msra.mxu0 %v2804_v27  ;;  %v3455_v27 = vld [vmem:[%s3816_s1 + $0x158] sm:$0xff] }
 0x48f   :  { %1441 = vmatpush.msra.mxu0 %v2810_v30  ;;  %v3463_v30 = vld [vmem:[%s3816_s1 + $0x150] sm:$0xff] }
 0x491   :  { %1442 = vmatpush.msra.mxu0 %v2817_v33  ;;  %v3470_v33 = vld [vmem:[%s3816_s1 + $0x148] sm:$0xff] }
 0x493   :  { %1443 = vmatpush.msra.mxu0 %v2822_v38  ;;  %v1161_v38 = vld.sshfl [vmem:[#allocation1 + $0x28] sm:$0xff pattern:$0x73625140] }
 0x495   :  { %1444 = vmatpush.msra.mxu0 %v2829_v39  ;;  %v1173_v39 = vpack.c.bf16 %v1161_v38, %v1161_v38 }
 0x497   :  { %1445 = vmatpush.msra.mxu0 %v2835_v45  ;;  %v3476_v45 = vld [vmem:[%s3816_s1 + $0x140] sm:$0xff] }
 0x499   :  { %1446 = vmatpush.msra.mxu0 %v2841_v47  ;;  %v3488_v47 = vld [vmem:[%s3816_s1 + $0xc8] sm:$0xff] }
 0x4c7   :  { %v1098_v18 = vpop.f32.mrf.mxu0 }
 0x4c8   :  { %2321 = vtanh.f32 %v1098_v18 }
 0x4ce   :  { %v2322_v17 = vpop.eup %2321 }
 0x4cf   :  { %2232 = vmatmul.msk.f32.vlgmr.msra.gmra.mxu1 %vm552_vm0, %v2322_v17 }
 0x4d0   :  { %1239 = vmatpush.bf16.msra.mxu1 %v3378_v55 }
 0x4d4   :  { %1240 = vmatpush.bf16.msra.mxu1 %v3402_v7 }
 0x4d7   :  { %1195 = vmatmul.bf16.vlgmr.msrb.gmra.mxu1 %v1169_v53 }
 0x4d8   :  { %1241 = vmatpush.bf16.msra.mxu1 %v3427_v11 }
 0x4dc   :  { %1242 = vmatpush.bf16.msra.mxu1 %v3447_v3 }
 0x4df   :  { %v1183_v14 = vpop.f32.mrf.mxu0 }
 0x4e0   :  { %1243 = vmatpush.bf16.msra.mxu1 %v3455_v27 }
 0x4e4   :  { %1244 = vmatpush.bf16.msra.mxu1 %v3463_v30 }
 0x4e5   :  { %v1222_v17 = vpop.f32.mrf.mxu3 }
 0x4e7   :  { %v1185_v18 = vpop.f32.mrf.mxu0 }
 0x4e8   :  { %1245 = vmatpush.bf16.msra.mxu1 %v3470_v33 }
 0x4ec   :  { %1246 = vmatpush.bf16.msra.mxu1 %v3476_v45  ;;  %v1209_v15 = vpop.f32.mrf.mxu2 }
 0x4ed   :  { %v1224_v38 = vpop.f32.mrf.mxu3 }
 0x4ee   :  { %v1304_v38 = vld [vmem:[%s3815_s0 + $0xe4] sm:$0xff] }
 0x4ef   :  { %1247 = vmatmul.bf16.vlgmr.msra.gmra.mxu1 %v1173_v39  ;;  %v1235_v56 = vpop.f32.mrf.mxu0  ;;  %1320 = vst [vmem:[#allocation1 + $0x2] ss:$4 sm:$0xff] %v1304_v38 }
 0x4f0   :  { %1388 = vmatpush.bf16.msrb.mxu1 %v3226_v31 }
 0x4f4   :  { %1389 = vmatpush.bf16.msrb.mxu1 %v3232_v32  ;;  %v1211_v53 = vpop.f32.mrf.mxu2 }
 0x4f7   :  { %v1237_v1 = vpop.f32.mrf.mxu0 }
 0x4f8   :  { %1390 = vmatpush.bf16.msrb.mxu1 %v3238_v35 }
 0x4fc   :  { %1391 = vmatpush.bf16.msrb.mxu1 %v3244_v36 }
 0x500   :  { %1392 = vmatpush.bf16.msrb.mxu1 %v3250_v61 }
 0x504   :  { %1393 = vmatpush.bf16.msrb.mxu1 %v3256_v9 }
 0x508   :  { %1394 = vmatpush.bf16.msrb.mxu1 %v3488_v47 }
 0x50c   :  { %1395 = vmatpush.bf16.msrb.mxu1 %v3494_v13 }
 0x510   :  { %1463 = vmatpush.msra.mxu1 %v3500_v46 }
 0x512   :  { %1464 = vmatpush.msra.mxu1 %v3506_v4 }
 0x514   :  { %1465 = vmatpush.msra.mxu1 %v3512_v12 }
 0x516   :  { %1466 = vmatpush.msra.mxu1 %v2866_v0  ;;  %v3525_v0 = vld [vmem:[%s3817_s2] ss:$0 sm:$0xff] }
 0x518   :  { %1467 = vmatpush.msra.mxu1 %v2872_v37 }
 0x51a   :  { %1468 = vmatpush.msra.mxu1 %v2884_v16 }
 0x51c   :  { %1469 = vmatpush.msra.mxu1 %v2890_v2  ;;  %v1184_v2 = vadd.f32 %v3525_v0, %v1183_v14  ;;  %v3537_v14 = vld [vmem:[%s3816_s1 + $0x128] sm:$0xff] }
 0x51e   :  { %1470 = vmatpush.msra.mxu1 %v2898_v8 }
 0x54c   :  { %v3520_v39 = vpop.f32.mrf.mxu1 }
 0x554   :  { %v1196_v5 = vpop.f32.mrf.mxu1 }
 0x555   :  { %v1197_v8 = vadd.f32 %v1196_v5, %v1184_v2  ;;  %v3555_v5 = vld [vmem:[%s3816_s1 + $0x110] sm:$0xff]  ;;  %v1306_v2 = vld [vmem:[%s3815_s0 + $0x138] sm:$0xff] }
 0x556   :  { %1322 = vst [vmem:[#allocation1 + $0x3] ss:$4 sm:$0xff] %v1306_v2 }
 0x557   :  { %v1210_v16 = vadd.f32 %v1209_v15, %v1197_v8  ;;  %v3567_v15 = vld [vmem:[%s3816_s1 + $0x100] sm:$0xff] }
 0x559   :  { %v1223_v18 = vadd.f32 %v1222_v17, %v1210_v16  ;;  %v1300_v17 = vld [vmem:[%s3815_s0 + $0x3c] sm:$0xff]  ;;  %v1301_v16 = vld [vmem:[%s3815_s0 + $0x44] sm:$0xf] }
 0x55a   :  { %1316 = vst [vmem:[#allocation1] ss:$4 sm:$0xff] %v1300_v17  ;;  %v1307_v17 = vld [vmem:[%s3815_s0 + $0x140] sm:$0xf] }
 0x55b   :  { %v1236_v40 = vadd.f32 %v1235_v56, %v1223_v18  ;;  %v1302_v56 = vld [vmem:[%s3815_s0 + $0x90] sm:$0xff]  ;;  %v1303_v18 = vld [vmem:[%s3815_s0 + $0x98] sm:$0xf]  ;;  %1324 = vst [vmem:[#allocation1 + $0x20] ss:$4 sm:$0xff] %v1301_v16 }
 0x55c   :  { %v1198_v37 = vpop.f32.mrf.mxu1  ;;  %1318 = vst [vmem:[#allocation1 + $0x1] ss:$4 sm:$0xff] %v1302_v56 }
 0x55d   :  { %1326 = vst [vmem:[#allocation1 + $0x21] ss:$4 sm:$0xff] %v1303_v18 }
 0x55e   :  { %1330 = vst [vmem:[#allocation1 + $0x23] ss:$4 sm:$0xff] %v1307_v17  ;;  %v1475_v17 = vld [vmem:[%s3815_s0 + $0x48] sm:$0xff] }
 0x563   :  { %v1331_v37 = vld.sshfl [vmem:[#allocation1] sm:$0xff pattern:$0x73625140] }
 0x564   :  { %v1343_v8 = vpack.c.bf16 %v1331_v37, %v1331_v37  ;;  %v1334_v37 = vld.sshfl [vmem:[#allocation1 + $0x18] sm:$0xff pattern:$0x73625140] }
 0x56c   :  { %v1248_v51 = vpop.f32.mrf.mxu1 }
 0x56d   :  { %v1249_v57 = vadd.f32 %v1248_v51, %v1236_v40  ;;  %v3543_v40 = vld [vmem:[%s3816_s1 + $0x120] sm:$0xff]  ;;  %v3561_v51 = vld [vmem:[%s3816_s1 + $0x108] sm:$0xff] }
 0x56f   :  { %v3528_v53 = vmax.f32 %v1249_v57, 0.0  ;;  %v3549_v57 = vld [vmem:[%s3816_s1 + $0x118] sm:$0xff] }
 0x571   :  { %3933 = vst [vmem:[#allocation14_spill] sm:$0xff] %v3528_v53  ;;  %2233 = vmatmul.msk.f32.vlgmr.msra.gmra.mxu2 %vm552_vm0, %v3528_v53  ;;  %v1346_v53 = vpack.c.bf16 %v1334_v37, %v1334_v37  ;;  %v1482_v37 = vld [vmem:[%s3815_s0 + $0x14c] sm:$0xf] }
 0x572   :  { %1401 = vmatpush.bf16.msra.mxu2 %v3279_v42 }
 0x573   :  { %1396 = vmatmul.bf16.vlgmr.msrb.gmra.mxu1 %v1346_v53 }
 0x574   :  { %v1250_v1 = vpop.f32.mrf.mxu1  ;;  %1537 = vmatpush.bf16.msrb.mxu1 %v3156_v6  ;;  %v2397_v6 = vld [vmem:[%s3818_s3 + $0x38] sm:$0xff] }
 0x575   :  { %v1305_v1 = vld [vmem:[%s3815_s0 + $0xec] sm:$0xf] }
 0x576   :  { %1402 = vmatpush.bf16.msra.mxu2 %v3285_v60  ;;  %1328 = vst [vmem:[#allocation1 + $0x22] ss:$4 sm:$0xff] %v1305_v1 }
 0x578   :  { %1538 = vmatpush.bf16.msrb.mxu1 %v3169_v22  ;;  %v2399_v22 = vld [vmem:[%s3818_s3 + $0x28] sm:$0xff] }
 0x579   :  { %1357 = vmatmul.bf16.vlgmr.msrb.gmra.mxu2 %v1343_v8 }
 0x57a   :  { %1403 = vmatpush.bf16.msra.mxu2 %v3537_v14 }
 0x57c   :  { %1539 = vmatpush.bf16.msrb.mxu1 %v3184_v28  ;;  %v2401_v28 = vld [vmem:[%s3818_s3 + $0x18] sm:$0xff] }
 0x57d   :  { %v1335_v56 = vld.sshfl [vmem:[#allocation1 + $0x20] sm:$0xff pattern:$0x73625140] }
 0x57e   :  { %1404 = vmatpush.bf16.msra.mxu2 %v3543_v40  ;;  %v1347_v2 = vpack.c.bf16 %v1335_v56, %v1335_v56 }
 0x580   :  { %1540 = vmatpush.bf16.msrb.mxu1 %v3198_v34  ;;  %v2403_v34 = vld [vmem:[%s3818_s3 + $0x8] sm:$0xff] }
 0x582   :  { %1405 = vmatpush.bf16.msra.mxu2 %v3549_v57 }
 0x584   :  { %1541 = vmatpush.bf16.msrb.mxu1 %v3365_v48 }
 0x586   :  { %1406 = vmatpush.bf16.msra.mxu2 %v3555_v5 }
 0x588   :  { %1542 = vmatpush.bf16.msrb.mxu1 %v3390_v20 }
 0x58a   :  { %1407 = vmatpush.bf16.msra.mxu2 %v3561_v51 }
 0x58c   :  { %1543 = vmatpush.bf16.msrb.mxu1 %v3414_v19 }
 0x58e   :  { %1408 = vmatpush.bf16.msra.mxu2 %v3567_v15 }
 0x590   :  { %1544 = vmatpush.bf16.msrb.mxu1 %v3440_v26 }
 0x591   :  { %1409 = vmatmul.bf16.vlgmr.msra.gmra.mxu2 %v1347_v2  ;;  %v1480_v2 = vld [vmem:[%s3815_s0 + $0xf8] sm:$0xf] }
 0x592   :  { %1550 = vmatpush.bf16.msrb.mxu2 %v3309_v24  ;;  %v1333_v24 = vld.sshfl [vmem:[#allocation1 + $0x10] sm:$0xff pattern:$0x73625140] }
 0x593   :  { %v1345_v38 = vpack.c.bf16 %v1333_v24, %v1333_v24  ;;  %v1476_v24 = vld [vmem:[%s3815_s0 + $0x50] sm:$0xf] }
 0x595   :  { %1383 = vmatmul.bf16.vlgmr.msrb.gmra.mxu0 %v1345_v38  ;;  %v1478_v38 = vld [vmem:[%s3815_s0 + $0xa4] sm:$0xf] }
 0x596   :  { %1551 = vmatpush.bf16.msrb.mxu2 %v3328_v63  ;;  %1524 = vmatpush.bf16.msrb.mxu0 %v3149_v41 }
 0x59a   :  { %1552 = vmatpush.bf16.msrb.mxu2 %v3336_v50  ;;  %1525 = vmatpush.bf16.msrb.mxu0 %v3162_v10  ;;  %v1332_v50 = vld.sshfl [vmem:[#allocation1 + $0x8] sm:$0xff pattern:$0x73625140]  ;;  %v2398_v10 = vld [vmem:[%s3818_s3 + $0x30] sm:$0xff] }
 0x59b   :  { %v1344_v41 = vpack.c.bf16 %v1332_v50, %v1332_v50  ;;  %1491 = vst [vmem:[#allocation1] ss:$4 sm:$0xff] %v1475_v17 }
 0x59e   :  { %1553 = vmatpush.bf16.msrb.mxu2 %v3344_v44  ;;  %1526 = vmatpush.bf16.msrb.mxu0 %v3177_v54  ;;  %v2400_v54 = vld [vmem:[%s3818_s3 + $0x20] sm:$0xff] }
 0x59f   :  { %v2404_v44 = vld [vmem:[%s3818_s3] sm:$0xff] }
 0x5a2   :  { %1554 = vmatpush.bf16.msrb.mxu2 %v3353_v43  ;;  %1527 = vmatpush.bf16.msrb.mxu0 %v3191_v58  ;;  %v2402_v58 = vld [vmem:[%s3818_s3 + $0x10] sm:$0xff]  ;;  %v1336_v43 = vld.sshfl [vmem:[#allocation1 + $0x28] sm:$0xff pattern:$0x73625140]  ;;  %s2419_s3 = smov 89  }
 0x5a3   :  { %1499 = vst [vmem:[#allocation1 + $0x20] ss:$4 sm:$0xff] %v1476_v24 }
 0x5a4   :  { %1501 = vst [vmem:[#allocation1 + $0x21] ss:$4 sm:$0xff] %v1478_v38 }
 0x5a5   :  { %1503 = vst [vmem:[#allocation1 + $0x22] ss:$4 sm:$0xff] %v1480_v2 }
 0x5a6   :  { %1555 = vmatpush.bf16.msrb.mxu2 %v3371_v52  ;;  %1528 = vmatpush.bf16.msrb.mxu0 %v3359_v59  ;;  %v1348_v59 = vpack.c.bf16 %v1336_v43, %v1336_v43  ;;  %1505 = vst [vmem:[#allocation1 + $0x23] ss:$4 sm:$0xff] %v1482_v37 }
 0x5aa   :  { %1556 = vmatpush.bf16.msrb.mxu2 %v3396_v21  ;;  %1529 = vmatpush.bf16.msrb.mxu0 %v3384_v49 }
 0x5ae   :  { %1557 = vmatpush.bf16.msrb.mxu2 %v3420_v29  ;;  %1530 = vmatpush.bf16.msrb.mxu0 %v3408_v23 }
 0x5b2   :  { %1614 = vmatpush.msra.mxu2 %v2397_v6  ;;  %1531 = vmatpush.bf16.msrb.mxu0 %v3433_v25 }
 0x5b4   :  { %1615 = vmatpush.msra.mxu2 %v2398_v10 }
 0x5b6   :  { %1616 = vmatpush.msra.mxu2 %v2399_v22  ;;  %v1511_v22 = vld.sshfl [vmem:[#allocation1 + $0x28] sm:$0xff pattern:$0x73625140] }
 0x5b8   :  { %1617 = vmatpush.msra.mxu2 %v2400_v54  ;;  %v1523_v54 = vpack.c.bf16 %v1511_v22, %v1511_v22 }
 0x5ba   :  { %1618 = vmatpush.msra.mxu2 %v2401_v28 }
 0x5bc   :  { %1619 = vmatpush.msra.mxu2 %v2402_v58 }
 0x5be   :  { %1620 = vmatpush.msra.mxu2 %v2403_v34 }
 0x5c0   :  { %1621 = vmatpush.msra.mxu2 %v2404_v44 }
 0x5f0   :  { %v1397_v49 = vpop.f32.mrf.mxu1 }
 0x5f4   :  { %v1273_v8 = vpop.f32.mrf.mxu2 }
 0x5f5   :  { %2323 = vtanh.f32 %v1273_v8  ;;  %v1510_v8 = vld.sshfl [vmem:[#allocation1 + $0x20] sm:$0xff pattern:$0x73625140] }
 0x5f6   :  { %v1522_v50 = vpack.c.bf16 %v1510_v8, %v1510_v8 }
 0x5f8   :  { %v1399_v23 = vpop.f32.mrf.mxu1 }
 0x5fb   :  { %v2324_v63 = vpop.eup %2323 }
 0x5fc   :  { %2234 = vmatmul.msk.f32.vlgmr.msra.gmra.mxu3 %vm552_vm0, %v2324_v63 }
 0x5fd   :  { %1414 = vmatpush.bf16.msra.mxu3 %v3378_v55 }
 0x601   :  { %1415 = vmatpush.bf16.msra.mxu3 %v3402_v7 }
 0x604   :  { %1370 = vmatmul.bf16.vlgmr.msrb.gmra.mxu3 %v1344_v41 }
 0x605   :  { %1416 = vmatpush.bf16.msra.mxu3 %v3427_v11 }
 0x609   :  { %1417 = vmatpush.bf16.msra.mxu3 %v3447_v3 }
 0x60d   :  { %1418 = vmatpush.bf16.msra.mxu3 %v3455_v27 }
 0x611   :  { %1419 = vmatpush.bf16.msra.mxu3 %v3463_v30 }
 0x612   :  { %v1384_v52 = vpop.f32.mrf.mxu0 }
 0x615   :  { %1420 = vmatpush.bf16.msra.mxu3 %v3470_v33 }
 0x619   :  { %1421 = vmatpush.bf16.msra.mxu3 %v3476_v45 }
 0x61a   :  { %v1386_v21 = vpop.f32.mrf.mxu0 }
 0x61c   :  { %1422 = vmatmul.bf16.vlgmr.msra.gmra.mxu3 %v1348_v59 }
 0x61d   :  { %1563 = vmatpush.bf16.msrb.mxu3 %v3226_v31  ;;  %v2405_v31 = vld [vmem:[%s3819_s4 + $0x20] sm:$0xff] }
 0x621   :  { %1564 = vmatpush.bf16.msrb.mxu3 %v3232_v32  ;;  %v2406_v32 = vld [vmem:[%s3819_s4 + $0x18] sm:$0xff] }
 0x625   :  { %1565 = vmatpush.bf16.msrb.mxu3 %v3238_v35  ;;  %v2407_v35 = vld [vmem:[%s3819_s4 + $0x10] sm:$0xff] }
 0x629   :  { %1566 = vmatpush.bf16.msrb.mxu3 %v3244_v36  ;;  %v2408_v36 = vld [vmem:[%s3819_s4 + $0x8] sm:$0xff] }
 0x62d   :  { %1567 = vmatpush.bf16.msrb.mxu3 %v3250_v61  ;;  %v2409_v61 = vld [vmem:[%s3819_s4] sm:$0xff] }
 0x631   :  { %1568 = vmatpush.bf16.msrb.mxu3 %v3256_v9  ;;  %v1358_v9 = vpop.f32.mrf.mxu2 }
 0x632   :  { %v1359_v26 = vadd.f32 %v3525_v0, %v1358_v9 }
 0x635   :  { %1569 = vmatpush.bf16.msrb.mxu3 %v3488_v47 }
 0x639   :  { %1570 = vmatpush.bf16.msrb.mxu3 %v3494_v13  ;;  %v1360_v48 = vpop.f32.mrf.mxu2 }
 0x63d   :  { %1638 = vmatpush.msra.mxu3 %v3500_v46 }
 0x63f   :  { %1639 = vmatpush.msra.mxu3 %v3506_v4 }
 0x641   :  { %1640 = vmatpush.msra.mxu3 %v3512_v12  ;;  %v1410_v20 = vpop.f32.mrf.mxu2 }
 0x643   :  { %1641 = vmatpush.msra.mxu3 %v2405_v31 }
 0x645   :  { %1642 = vmatpush.msra.mxu3 %v2406_v32 }
 0x647   :  { %1643 = vmatpush.msra.mxu3 %v2407_v35 }
 0x649   :  { %1644 = vmatpush.msra.mxu3 %v2408_v36  ;;  %v1412_v29 = vpop.f32.mrf.mxu2 }
 0x64b   :  { %1645 = vmatpush.msra.mxu3 %v2409_v61 }
 0x67f   :  { %v3677_v19 = vpop.f32.mrf.mxu3 }
 0x687   :  { %v1371_v25 = vpop.f32.mrf.mxu3 }
 0x688   :  { %v1372_v13 = vadd.f32 %v1371_v25, %v1359_v26 }
 0x68a   :  { %v1385_v46 = vadd.f32 %v1384_v52, %v1372_v13 }
 0x68c   :  { %v1398_v4 = vadd.f32 %v1397_v49, %v1385_v46 }
 0x68e   :  { %v1411_v12 = vadd.f32 %v1410_v20, %v1398_v4  ;;  %v3935_v20 = vld [vmem:[#allocation10_spill] sm:$0xff] }
 0x68f   :  { %v1373_v47 = vpop.f32.mrf.mxu3 }
 0x69f   :  { %v1423_v53 = vpop.f32.mrf.mxu3 }
 0x6a0   :  { %v1424_v16 = vadd.f32 %v1423_v53, %v1411_v12 }
 0x6a2   :  { %v3680_v18 = vmax.f32 %v1424_v16, 0.0 }
 0x6a4   :  { %2235 = vmatmul.msk.f32.vlgmr.msra.gmra.mxu0 %vm552_vm0, %v3680_v18 }
 0x6a5   :  { %1576 = vmatpush.bf16.msra.mxu0 %v3279_v42  ;;  %v1477_v42 = vld [vmem:[%s3815_s0 + $0x9c] sm:$0xff] }
 0x6a6   :  { %1493 = vst [vmem:[#allocation1 + $0x1] ss:$4 sm:$0xff] %v1477_v42 }
 0x6a7   :  { %v1425_v1 = vpop.f32.mrf.mxu3 }
 0x6a9   :  { %1577 = vmatpush.bf16.msra.mxu0 %v3285_v60  ;;  %v1479_v60 = vld [vmem:[%s3815_s0 + $0xf0] sm:$0xff] }
 0x6aa   :  { %1495 = vst [vmem:[#allocation1 + $0x2] ss:$4 sm:$0xff] %v1479_v60 }
 0x6ad   :  { %1578 = vmatpush.bf16.msra.mxu0 %v3537_v14  ;;  %v1481_v14 = vld [vmem:[%s3815_s0 + $0x144] sm:$0xff]  ;;  %s2415_s0 = smov 64  }
 0x6ae   :  { %1497 = vst [vmem:[#allocation1 + $0x3] ss:$4 sm:$0xff] %v1481_v14 }
 0x6b1   :  { %1579 = vmatpush.bf16.msra.mxu0 %v3543_v40 }
 0x6b5   :  { %1580 = vmatpush.bf16.msra.mxu0 %v3549_v57  ;;  %v1506_v40 = vld.sshfl [vmem:[#allocation1] sm:$0xff pattern:$0x73625140]  ;;  %v1507_v6 = vld.sshfl [vmem:[#allocation1 + $0x8] sm:$0xff pattern:$0x73625140] }
 0x6b6   :  { %v1518_v57 = vpack.c.bf16 %v1506_v40, %v1506_v40  ;;  %v1519_v10 = vpack.c.bf16 %v1507_v6, %v1507_v6 }
 0x6b8   :  { %1532 = vmatmul.bf16.vlgmr.msrb.gmra.mxu0 %v1518_v57 }
 0x6b9   :  { %1581 = vmatpush.bf16.msra.mxu0 %v3555_v5  ;;  %v1508_v5 = vld.sshfl [vmem:[#allocation1 + $0x10] sm:$0xff pattern:$0x73625140] }
 0x6bd   :  { %1582 = vmatpush.bf16.msra.mxu0 %v3561_v51  ;;  %v1520_v51 = vpack.c.bf16 %v1508_v5, %v1508_v5 }
 0x6bf   :  { %1558 = vmatmul.bf16.vlgmr.msrb.gmra.mxu2 %v1520_v51 }
 0x6c1   :  { %1583 = vmatpush.bf16.msra.mxu0 %v3567_v15  ;;  %v1509_v15 = vld.sshfl [vmem:[#allocation1 + $0x18] sm:$0xff pattern:$0x73625140] }
 0x6c2   :  { %v1521_v56 = vpack.c.bf16 %v1509_v15, %v1509_v15 }
 0x6c4   :  { %1571 = vmatmul.bf16.vlgmr.msrb.gmra.mxu3 %v1521_v56 }
 0x6c8   :  { %1584 = vmatmul.bf16.vlgmr.msra.gmra.mxu0 %v1522_v50 }
 0x721   :  { %v1448_v63 = vpop.f32.mrf.mxu0 }
 0x722   :  { %2325 = vtanh.f32 %v1448_v63 }
 0x728   :  { %v2326_v41 = vpop.eup %2325 }
 0x729   :  { %2236 = vmatmul.msk.f32.vlgmr.msra.gmra.mxu1 %vm552_vm0, %v2326_v41 }
 0x72a   :  { %1589 = vmatpush.bf16.msra.mxu1 %v3378_v55 }
 0x72e   :  { %1590 = vmatpush.bf16.msra.mxu1 %v3402_v7 }
 0x731   :  { %1545 = vmatmul.bf16.vlgmr.msrb.gmra.mxu1 %v1519_v10 }
 0x732   :  { %1591 = vmatpush.bf16.msra.mxu1 %v3427_v11 }
 0x735   :  { %v1533_v55 = vpop.f32.mrf.mxu0 }
 0x736   :  { %1592 = vmatpush.bf16.msra.mxu1 %v3447_v3 }
 0x73a   :  { %1593 = vmatpush.bf16.msra.mxu1 %v3455_v27  ;;  %v1534_v27 = vadd.f32 %v3525_v0, %v1533_v55  ;;  %v3934_v0 = vld [vmem:[#allocation6_spill] sm:$0xff] }
 0x73b   :  { %v1650_v49 = vmax.f32 %v3934_v0, %v3104_v62 }
 0x73d   :  { %v1535_v28 = vpop.f32.mrf.mxu0  ;;  %v1651_v21 = vmax.f32 %v1650_v49, %v3935_v20 }
 0x73e   :  { %1594 = vmatpush.bf16.msra.mxu1 %v3463_v30 }
 0x73f   :  { %v1652_v23 = vmax.f32 %v1651_v21, %v3520_v39  ;;  %v3936_v21 = vld [vmem:[#allocation30_spill] sm:$0xff] }
 0x741   :  { %v1653_v29 = vmax.f32 %v1652_v23, %v3677_v19 }
 0x742   :  { %1595 = vmatpush.bf16.msra.mxu1 %v3470_v33  ;;  %v1559_v58 = vpop.f32.mrf.mxu2 }
 0x745   :  { %v1585_v34 = vpop.f32.mrf.mxu0 }
 0x746   :  { %1596 = vmatpush.bf16.msra.mxu1 %v3476_v45 }
 0x747   :  { %v1572_v7 = vpop.f32.mrf.mxu3 }
 0x749   :  { %1597 = vmatmul.bf16.vlgmr.msra.gmra.mxu1 %v1523_v54 }
 0x74a   :  { %v1561_v44 = vpop.f32.mrf.mxu2 }
 0x74d   :  { %v1587_v3 = vpop.f32.mrf.mxu0 }
 0x74f   :  { %v1574_v11 = vpop.f32.mrf.mxu3 }
 0x7a6   :  { %v1472_v43 = vpop.f32.mrf.mxu1 }
 0x7a7   :  { %v1654_v25 = vmax.f32 %v1653_v29, %v1472_v43  ;;  %v3937_v29 = vld [vmem:[#allocation8_spill] sm:$0xff] }
 0x7ae   :  { %v1546_v59 = vpop.f32.mrf.mxu1 }
 0x7af   :  { %v1547_v31 = vadd.f32 %v1546_v59, %v1534_v27 }
 0x7b1   :  { %v1560_v33 = vadd.f32 %v1559_v58, %v1547_v31 }
 0x7b3   :  { %v1573_v32 = vadd.f32 %v1572_v7, %v1560_v33  ;;  %v2411_v33 = vmov 1  }
 0x7b5   :  { %v1586_v35 = vadd.f32 %v1585_v34, %v1573_v32  ;;  %v2412_v32 = vmov 2  }
 0x7b6   :  { %v1548_v30 = vpop.f32.mrf.mxu1 }
 0x7c6   :  { %v1598_v36 = vpop.f32.mrf.mxu1 }
 0x7c7   :  { %v1599_v45 = vadd.f32 %v1598_v36, %v1586_v35  ;;  %v2413_v35 = vmov 3   ;;  %v2414_v36 = vmov 4  }
 0x7c9   :  { %v3726_v61 = vmax.f32 %v1599_v45, 0.0 }
 0x7cb   :  { %2237 = vmatmul.msk.f32.vlgmr.msra.gmra.mxu2 %vm552_vm0, %v3726_v61 }
 0x7ce   :  { %v1600_v9 = vpop.f32.mrf.mxu1 }
 0x84e   :  { %v1623_v48 = vpop.f32.mrf.mxu2 }
 0x84f   :  { %2327 = vtanh.f32 %v1623_v48 }
 0x855   :  { %v2328_v52 = vpop.eup %2327 }
 0x856   :  { %2238 = vmatmul.msk.f32.vlgmr.msra.gmra.mxu3 %vm552_vm0, %v2328_v52 }
 0x8d9   :  { %v1647_v26 = vpop.f32.mrf.mxu3 }
 0x8da   :  { %v1655_v47 = vmax.f32 %v1654_v25, %v1647_v26 }
 0x8dc   :  { %v1656_v13 = vsub.f32 %v3934_v0, %v1655_v47  ;;  %v1659_v46 = vsub.f32 %v3104_v62, %v1655_v47  ;;  %v1662_v4 = vsub.f32 %v3935_v20, %v1655_v47  ;;  %v1665_v12 = vsub.f32 %v3520_v39, %v1655_v47 }
 0x8dd   :  { %v1668_v17 = vsub.f32 %v3677_v19, %v1655_v47  ;;  %v1671_v60 = vsub.f32 %v1472_v43, %v1655_v47  ;;  %v1674_v40 = vsub.f32 %v1647_v26, %v1655_v47  ;;  %v2410_v62 = vmov 0   ;;  %v3938_v26 = vld [vmem:[#allocation9_spill] sm:$0xff] }
 0x8de   :  { %v1657_v53 = vmul.f32 1.442695, %v1656_v13  ;;  %v1660_v16 = vmul.f32 1.442695, %v1659_v46  ;;  %v1663_v1 = vmul.f32 1.442695, %v1662_v4  ;;  %2301 = vset.pattern.permute.xlu2 %v2410_v62  ;;  %2300 = vset.pattern.permute.xlu1 %v2410_v62 }
 0x8df   :  { %v1666_v42 = vmul.f32 1.442695, %v1665_v12  ;;  %v1669_v14 = vmul.f32 1.442695, %v1668_v17  ;;  %v1672_v57 = vmul.f32 1.442695, %v1671_v60  ;;  %2299 = vset.pattern.permute.xlu0 %v2410_v62 }
 0x8e0   :  { %2329 = vpow2.f32 %v1657_v53  ;;  %v1675_v39 = vmul.f32 1.442695, %v1674_v40  ;;  %v3939_v46 = vld [vmem:[#allocation11_spill] sm:$0xff] }
 0x8e1   :  { %2331 = vpow2.f32 %v1660_v16  ;;  %v3940_v16 = vld [vmem:[#allocation14_spill] sm:$0xff] }
 0x8e2   :  { %2333 = vpow2.f32 %v1663_v1 }
 0x8e3   :  { %2335 = vpow2.f32 %v1666_v42 }
 0x8e4   :  { %2337 = vpow2.f32 %v1669_v14 }
 0x8e5   :  { %2339 = vpow2.f32 %v1672_v57 }
 0x8e6   :  { %v2330_v5 = vpop.eup %2329  ;;  %2341 = vpow2.f32 %v1675_v39 }
 0x8e7   :  { %v2332_v51 = vpop.eup %2331 }
 0x8e8   :  { %v1677_v15 = vadd.f32 %v2332_v51, %v2330_v5  ;;  %v2334_v24 = vpop.eup %2333 }
 0x8e9   :  { %v2336_v56 = vpop.eup %2335 }
 0x8ea   :  { %v1678_v19 = vadd.f32 %v2334_v24, %v1677_v15  ;;  %v2338_v2 = vpop.eup %2337 }
 0x8eb   :  { %v2340_v8 = vpop.eup %2339 }
 0x8ec   :  { %v1679_v38 = vadd.f32 %v2336_v56, %v1678_v19  ;;  %v2342_v50 = vpop.eup %2341 }
 0x8ee   :  { %v1680_v37 = vadd.f32 %v2338_v2, %v1679_v38 }
 0x8f0   :  { %v1681_v63 = vadd.f32 %v2340_v8, %v1680_v37 }
 0x8f2   :  { %v1682_v41 = vadd.f32 %v2342_v50, %v1681_v63 }
 0x8f4   :  { %2343 = vrcp.f32 %v1682_v41  ;;  %v1694_v54 = vand.u32 2147483648, %v1682_v41  ;;  %v1692_v28 = vand.u32 2147483647, %v1682_v41  ;;  %vm1688_vm2 = vweird.f32 %v1682_v41 }
 0x8f6   :  { %v1695_v7 = vor.u32 1.1754944e-38, %v1694_v54  ;;  %vm1693_vm4 = vcmp.eq.f32.partialorder %v1692_v28, 8.507059e+37 }
 0x8fa   :  { %v2344_v6 = vpop.eup %2343 }
 0x8fb   :  { %v1684_v10 = vmul.f32 %v2344_v6, %v1682_v41  ;;  %vm1689_vm1 = vweird.f32 %v2344_v6 }
 0x8fc   :  { %vm1690_vm3 = vmor %vm1688_vm2, %vm1689_vm1 }
 0x8fd   :  { %v1685_v22 = vsub.f32 1.0, %v1684_v10 }
 0x8ff   :  { %v1686_v55 = vmul.f32 %v2344_v6, %v1685_v22 }
 0x901   :  { %v1687_v58 = vadd.f32 %v2344_v6, %v1686_v55 }
 0x903   :  { %v1691_v34 = vsel %vm1690_vm3, %v2344_v6, %v1687_v58 }
 0x904   :  { %v1696_v44 = vsel %vm1693_vm4, %v1695_v7, %v1691_v34 }
 0x905   :  { %v3741_v11 = vmul.f32 %v2338_v2, %v1696_v44  ;;  %v1699_v43 = vmul.f32 %v2334_v24, %v1696_v44  ;;  %v1697_v3 = vmul.f32 %v2330_v5, %v1696_v44  ;;  %v3744_v59 = vmul.f32 %v2340_v8, %v1696_v44 }
 0x906   :  { %v1700_v27 = vmul.f32 %v2336_v56, %v1696_v44  ;;  %v1698_v30 = vmul.f32 %v2332_v51, %v1696_v44  ;;  %v3747_v31 = vmul.f32 %v2342_v50, %v1696_v44 }
 0x907   :  { %1733 = vperm.xlu2 %2301, %v3741_v11   ;;  %1719 = vperm.xlu1 %2300, %v1699_v43  }
 0x908   :  { %1706 = vperm.xlu0 %2299, %v1697_v3  }
 0x90f   :  { %1740 = vperm.xlu2 %2301, %v3744_v59   ;;  %1726 = vperm.xlu1 %2300, %v1700_v27  }
 0x910   :  { %1712 = vperm.xlu0 %2299, %v1698_v30  }
 0x917   :  { %2303 = vset.pattern.permute.xlu2 %v2411_v33  ;;  %2302 = vset.pattern.permute.xlu1 %v2411_v33 }
 0x918   :  { %1747 = vperm.xlu0 %2299, %v3747_v31   ;;  %1758 = vperm.xlu2 %2303, %v1698_v30  }
 0x919   :  { %1753 = vperm.xlu1 %2302, %v1697_v3  }
 0x920   :  { %2304 = vset.pattern.permute.xlu0 %v2411_v33  ;;  %1776 = vperm.xlu2 %2303, %v3741_v11  }
 0x921   :  { %1770 = vperm.xlu1 %2302, %v1700_v27   ;;  %1764 = vperm.xlu0 %2304, %v1699_v43  }
 0x928   :  { %1788 = vperm.xlu2 %2303, %v3747_v31  }
 0x929   :  { %1782 = vperm.xlu1 %2302, %v3744_v59   ;;  %2305 = vset.pattern.permute.xlu0 %v2412_v32 }
 0x92a   :  { %1794 = vperm.xlu0 %2305, %v1697_v3  }
 0x930   :  { %2307 = vset.pattern.permute.xlu2 %v2412_v32 }
 0x931   :  { %2306 = vset.pattern.permute.xlu1 %v2412_v32  ;;  %1805 = vperm.xlu2 %2307, %v1699_v43  }
 0x932   :  { %1799 = vperm.xlu1 %2306, %v1698_v30   ;;  %1823 = vperm.xlu0 %2305, %v3744_v59  }
 0x939   :  { %1817 = vperm.xlu2 %2307, %v3741_v11  }
 0x93a   :  { %1811 = vperm.xlu1 %2306, %v1700_v27   ;;  %2309 = vset.pattern.permute.xlu0 %v2413_v35 }
 0x93b   :  { %1840 = vperm.xlu0 %2309, %v1698_v30  }
 0x941   :  { %2308 = vset.pattern.permute.xlu2 %v2413_v35 }
 0x942   :  { %1829 = vperm.xlu1 %2306, %v3747_v31   ;;  %1835 = vperm.xlu2 %2308, %v1697_v3  }
 0x943   :  { %1870 = vperm.xlu0 %2309, %v3747_v31  }
 0x94a   :  { %2310 = vset.pattern.permute.xlu1 %v2413_v35  ;;  %1852 = vperm.xlu2 %2308, %v1700_v27  }
 0x94b   :  { %1846 = vperm.xlu1 %2310, %v1699_v43   ;;  %2313 = vset.pattern.permute.xlu0 %v2414_v36 }
 0x94c   :  { %1887 = vperm.xlu0 %2313, %v1699_v43  }
 0x952   :  { %1864 = vperm.xlu2 %2308, %v3744_v59  }
 0x953   :  { %1858 = vperm.xlu1 %2310, %v3741_v11  }
 0x954   :  { %1924 = vrot.lane.b32.xlu0 %v1697_v3, %s2415_s0 }
 0x95a   :  { %2312 = vset.pattern.permute.xlu2 %v2414_v36 }
 0x95b   :  { %2311 = vset.pattern.permute.xlu1 %v2414_v36  ;;  %1881 = vperm.xlu2 %2312, %v1698_v30  }
 0x95c   :  { %1876 = vperm.xlu1 %2311, %v1697_v3   ;;  %1933 = vrot.lane.b32.xlu0 %v1700_v27, %s2416_s8 }
 0x961   :  { %v1734_v45 = vpop.permute.xlu2 %1733 }
 0x962   :  { %v1736_v1 = vmul.f32 %v1734_v45, %v3940_v16 }
 0x963   :  { %1899 = vperm.xlu2 %2312, %v3741_v11  }
 0x964   :  { %1893 = vperm.xlu1 %2311, %v1700_v27  }
 0x969   :  { %v1741_v9 = vpop.permute.xlu2 %1740 }
 0x96a   :  { %v1743_v60 = vmul.f32 %v1741_v9, %v3680_v18 }
 0x96b   :  { %1911 = vperm.xlu2 %2312, %v3747_v31  }
 0x96c   :  { %1905 = vperm.xlu1 %2311, %v3744_v59  }
 0x972   :  { %v1759_v0 = vpop.permute.xlu2 %1758 }
 0x973   :  { %1930 = vrot.lane.b32.xlu2 %v1699_v43, %s2417_s9  ;;  %v1761_v39 = vmul.f32 %v1759_v0, %v3937_v29 }
 0x974   :  { %1927 = vrot.lane.b32.xlu1 %v1698_v30, %s2418_s10 }
 0x979   :  { %v1720_v48 = vpop.permute.xlu1 %1719 }
 0x97a   :  { %v1707_v52 = vpop.permute.xlu0 %1706  ;;  %v1722_v47 = vmul.f32 %v1720_v48, %v3938_v26  ;;  %v1777_v53 = vpop.permute.xlu2 %1776 }
 0x97b   :  { %1939 = vrot.lane.b32.xlu2 %v3744_v59, %s2419_s3  ;;  %v1709_v23 = vmul.f32 %v1707_v52, %v3936_v21  ;;  %v1779_v63 = vmul.f32 %v1777_v53, %v3940_v16 }
 0x97c   :  { %1936 = vrot.lane.b32.xlu1 %v3741_v11, %s2420_s11 }
 0x981   :  { %v1727_v49 = vpop.permute.xlu1 %1726 }
 0x982   :  { %v1713_v20 = vpop.permute.xlu0 %1712  ;;  %v1729_v4 = vmul.f32 %v1727_v49, %v3939_v46  ;;  %v1789_v15 = vpop.permute.xlu2 %1788 }
 0x983   :  { %v1715_v25 = vmul.f32 %v1713_v20, %v3937_v29  ;;  %v1791_v22 = vmul.f32 %v1789_v15, %v3726_v61 }
 0x984   :  { %1942 = vrot.lane.b32.xlu1 %v3747_v31, %s2421_s12 }
 0x985   :  { %v1716_v13 = vadd.f32 %v1715_v25, %v1709_v23 }
 0x987   :  { %v1723_v12 = vadd.f32 %v1722_v47, %v1716_v13 }
 0x989   :  { %v1730_v17 = vadd.f32 %v1729_v4, %v1723_v12 }
 0x98a   :  { %v1748_v42 = vpop.permute.xlu0 %1747 }
 0x98b   :  { %v1737_v14 = vadd.f32 %v1736_v1, %v1730_v17  ;;  %v1754_v40 = vpop.permute.xlu1 %1753  ;;  %v1750_v5 = vmul.f32 %v1748_v42, %v3726_v61  ;;  %v1806_v10 = vpop.permute.xlu2 %1805 }
 0x98c   :  { %v1756_v51 = vmul.f32 %v1754_v40, %v3936_v21  ;;  %v1808_v44 = vmul.f32 %v1806_v10, %v3938_v26 }
 0x98d   :  { %v1744_v57 = vadd.f32 %v1743_v60, %v1737_v14 }
 0x98e   :  { %v1762_v56 = vadd.f32 %v1761_v39, %v1756_v51 }
 0x98f   :  { %v3773_v62 = vadd.f32 %v1750_v5, %v1744_v57 }
 0x993   :  { %v1771_v24 = vpop.permute.xlu1 %1770  ;;  %v1765_v19 = vpop.permute.xlu0 %1764 }
 0x994   :  { %v1767_v38 = vmul.f32 %v1765_v19, %v3938_v26  ;;  %v1773_v2 = vmul.f32 %v1771_v24, %v3939_v46  ;;  %v1818_v11 = vpop.permute.xlu2 %1817 }
 0x995   :  { %v1820_v31 = vmul.f32 %v1818_v11, %v3940_v16 }
 0x996   :  { %v1768_v37 = vadd.f32 %v1767_v38, %v1762_v56 }
 0x998   :  { %v1774_v8 = vadd.f32 %v1773_v2, %v1768_v37 }
 0x99a   :  { %v1780_v41 = vadd.f32 %v1779_v63, %v1774_v8 }
 0x99b   :  { %v1783_v50 = vpop.permute.xlu1 %1782 }
 0x99c   :  { %v1785_v6 = vmul.f32 %v1783_v50, %v3680_v18  ;;  %v1795_v28 = vpop.permute.xlu0 %1794  ;;  %v1836_v32 = vpop.permute.xlu2 %1835 }
 0x99d   :  { %v1797_v7 = vmul.f32 %v1795_v28, %v3936_v21  ;;  %v1838_v25 = vmul.f32 %v1836_v32, %v3936_v21 }
 0x99e   :  { %v1786_v54 = vadd.f32 %v1785_v6, %v1780_v41 }
 0x9a0   :  { %v1792_v55 = vadd.f32 %v1791_v22, %v1786_v54 }
 0x9a2   :  { %1917 = vrot.lane.b32.xlu2 %v1792_v55, %s2415_s0 }
 0x9a4   :  { %v1800_v58 = vpop.permute.xlu1 %1799  ;;  %v1824_v30 = vpop.permute.xlu0 %1823 }
 0x9a5   :  { %v1802_v34 = vmul.f32 %v1800_v58, %v3937_v29  ;;  %v1826_v35 = vmul.f32 %v1824_v30, %v3680_v18  ;;  %v1853_v49 = vpop.permute.xlu2 %1852 }
 0x9a6   :  { %v1855_v12 = vmul.f32 %v1853_v49, %v3939_v46 }
 0x9a7   :  { %v1803_v43 = vadd.f32 %v1802_v34, %v1797_v7 }
 0x9a9   :  { %v1809_v3 = vadd.f32 %v1808_v44, %v1803_v43 }
 0x9ac   :  { %v1812_v59 = vpop.permute.xlu1 %1811 }
 0x9ad   :  { %v1814_v27 = vmul.f32 %v1812_v59, %v3939_v46  ;;  %v1841_v0 = vpop.permute.xlu0 %1840  ;;  %v1865_v53 = vpop.permute.xlu2 %1864 }
 0x9ae   :  { %v1843_v20 = vmul.f32 %v1841_v0, %v3937_v29  ;;  %v1867_v14 = vmul.f32 %v1865_v53, %v3680_v18 }
 0x9af   :  { %v1815_v33 = vadd.f32 %v1814_v27, %v1809_v3 }
 0x9b0   :  { %v1844_v13 = vadd.f32 %v1843_v20, %v1838_v25 }
 0x9b1   :  { %v1821_v36 = vadd.f32 %v1820_v31, %v1815_v33 }
 0x9b3   :  { %v1827_v45 = vadd.f32 %v1826_v35, %v1821_v36 }
 0x9b4   :  { %v1830_v9 = vpop.permute.xlu1 %1829 }
 0x9b5   :  { %v1832_v48 = vmul.f32 %v1830_v9, %v3726_v61  ;;  %v1871_v60 = vpop.permute.xlu0 %1870  ;;  %v1882_v15 = vpop.permute.xlu2 %1881 }
 0x9b6   :  { %v1873_v57 = vmul.f32 %v1871_v60, %v3726_v61  ;;  %v1884_v56 = vmul.f32 %v1882_v15, %v3937_v29 }
 0x9b7   :  { %v3790_v52 = vadd.f32 %v1832_v48, %v1827_v45 }
 0x9bd   :  { %v1847_v23 = vpop.permute.xlu1 %1846  ;;  %v1900_v38 = vpop.permute.xlu2 %1899 }
 0x9be   :  { %v1849_v47 = vmul.f32 %v1847_v23, %v3938_v26  ;;  %v1888_v2 = vpop.permute.xlu0 %1887  ;;  %v1902_v10 = vmul.f32 %v1900_v38, %v3940_v16 }
 0x9bf   :  { %v1890_v63 = vmul.f32 %v1888_v2, %v3938_v26 }
 0x9c0   :  { %v1850_v4 = vadd.f32 %v1849_v47, %v1844_v13 }
 0x9c2   :  { %v1856_v17 = vadd.f32 %v1855_v12, %v1850_v4 }
 0x9c5   :  { %v1859_v1 = vpop.permute.xlu1 %1858  ;;  %v1912_v54 = vpop.permute.xlu2 %1911 }
 0x9c6   :  { %v1861_v42 = vmul.f32 %v1859_v1, %v3940_v16  ;;  %v1914_v29 = vmul.f32 %v1912_v54, %v3726_v61  ;;  %v1925_v7 = vpop.permute.xlu0 %1924 }
 0x9c8   :  { %v1862_v40 = vadd.f32 %v1861_v42, %v1856_v17 }
 0x9ca   :  { %v1868_v5 = vadd.f32 %v1867_v14, %v1862_v40 }
 0x9cc   :  { %v1874_v51 = vadd.f32 %v1873_v57, %v1868_v5 }
 0x9cd   :  { %v1931_v34 = vpop.permute.xlu2 %1930 }
 0x9ce   :  { %1921 = vrot.lane.b32.xlu0 %v1874_v51, %s2415_s0  ;;  %v1877_v39 = vpop.permute.xlu1 %1876  ;;  %v1934_v16 = vpop.permute.xlu0 %1933 }
 0x9cf   :  { %v1879_v19 = vmul.f32 %v1877_v39, %v3936_v21 }
 0x9d1   :  { %v1885_v37 = vadd.f32 %v1884_v56, %v1879_v19 }
 0x9d3   :  { %v1891_v41 = vadd.f32 %v1890_v63, %v1885_v37 }
 0x9d6   :  { %v1894_v24 = vpop.permute.xlu1 %1893 }
 0x9d7   :  { %v1896_v50 = vmul.f32 %v1894_v24, %v3939_v46 }
 0x9d9   :  { %v1897_v6 = vadd.f32 %v1896_v50, %v1891_v41 }
 0x9db   :  { %v1903_v55 = vadd.f32 %v1902_v10, %v1897_v6 }
 0x9de   :  { %v1906_v8 = vpop.permute.xlu1 %1905 }
 0x9df   :  { %v1908_v22 = vmul.f32 %v1906_v8, %v3680_v18  ;;  %v1940_v18 = vpop.permute.xlu2 %1939 }
 0x9e1   :  { %v1909_v21 = vadd.f32 %v1908_v22, %v1903_v55 }
 0x9e3   :  { %v1915_v58 = vadd.f32 %v1914_v29, %v1909_v21 }
 0x9e5   :  { %v1947_v26 = vsel %vm552_vm0, %v1915_v58, %v1925_v7 }
 0x9e6   :  { %v1928_v28 = vpop.permute.xlu1 %1927 }
 0x9e7   :  { %v1949_v46 = vsel %vm1948_vm5, %v1947_v26, %v1928_v28 }
 0x9e8   :  { %v1951_v11 = vsel %vm1950_vm6, %v1949_v46, %v1931_v34 }
 0x9e9   :  { %v1953_v43 = vsel %vm1952_vm7, %v1951_v11, %v1934_v16 }
 0x9ee   :  { %v1937_v44 = vpop.permute.xlu1 %1936 }
 0x9ef   :  { %v1955_v3 = vsel %vm1954_vm8, %v1953_v43, %v1937_v44 }
 0x9f0   :  { %v1957_v61 = vsel %vm1956_vm9, %v1955_v3, %v1940_v18 }
 0x9f6   :  { %v1943_v59 = vpop.permute.xlu1 %1942 }
 0x9f7   :  { %v1959_v27 = vsel %vm1958_vm10, %v1957_v61, %v1943_v59 }
 0x9f8   :  { %v1961_v30 = vsel %vm1960_vm11, %v1959_v27, 0.0 }
 0x9f9   :  { %v1966_v36 = vrot.slane %v1961_v30, 4 }
 0x9fc   :  { %v1918_v31 = vpop.permute.xlu2 %1917 }
 0x9fd   :  { %v1945_v45 = vsel %vm552_vm0, %v3773_v62, %v1918_v31 }
 0xa40   :  { %v1922_v33 = vpop.permute.xlu0 %1921 }
 0xa41   :  { %v1946_v32 = vsel %vm552_vm0, %v3790_v52, %v1922_v33 }
 0xa42   :  { %v1965_v35 = vrot.slane %v1946_v32, 6 }
 0xa44   :  { %v1968_v9 = vsel %vm1967_vm12, %v1945_v45, %v1965_v35 }
 0xa45   :  { %v1970_v48 = vsel %vm1969_vm13, %v1968_v9, %v1966_v36 }
 0xa46   :  { %1988 = vst [vmem:[#allocation2] sm:$0x3f] %v1970_v48 }
 0xa4d   :  { %v2010_v0 = vld [vmem:[#allocation2] sm:$0x3f] }
 0xa4e   :  { %2011 = vst [vmem:[%s3820_s5] sm:$0x3f] %v2010_v0 }

</bundles_post_ra>
